<compile_context>
chip_gen: v7x
topology: tpu7x:2x2x1
jax: 0.10.0
libtpu: 0.0.40
codegen_flags: <defaults>
</compile_context>

<pallas_src>
from functools import partial

import jax
import jax.numpy as jnp
from jax.experimental import pallas as pl
from jax.experimental.pallas import tpu as pltpu

EPS = 1e-5
_BF16 = jnp.bfloat16
_VMEM_LIMIT_BYTES = 32 * 1024 * 1024      # explicit scoped-VMEM limit (safe on v5e/v6e/v7x)
_TILE_VMEM_BUDGET = 24 * 1024 * 1024      # per-tile working-set budget (headroom under the limit)


# ----------------------------- in-kernel helpers -----------------------------

def _conv3x3_rows(a, w, tr, wh, ci):
    """3x3 'valid' conv over a row tile that already carries its 1-row halo.

    a: (tr+2, wh, ci) bf16   (halo rows included, W not yet padded)
    w: (9*ci, co) bf16       (taps flattened (dy, dx, ci) row-major)
    returns: (tr*wh, co) f32 accumulator.
    """
    co = w.shape[-1]
    # reflect-pad W in-VMEM (2 extra columns only; H halo already present).
    ap = jnp.concatenate([a[:, 1:2], a, a[:, wh - 2:wh - 1]], axis=1)   # (tr+2, wh+2, ci)

    if ci < 128:
        # im2col: fold the 9 taps into the contraction dim -> one MXU matmul, K = 9*ci.
        taps = [ap[dy:dy + tr, dx:dx + wh, :] for dy in range(3) for dx in range(3)]
        patches = jnp.concatenate(taps, axis=-1).reshape(tr * wh, 9 * ci)
        return jnp.dot(patches, w, preferred_element_type=jnp.float32)

    # Large-C fallback: K = ci per tap is already MXU-friendly; avoid 9x im2col VMEM.
    acc = jnp.zeros((tr * wh, co), jnp.float32)
    t = 0
    for dy in range(3):
        for dx in range(3):
            patch = ap[dy:dy + tr, dx:dx + wh, :].reshape(tr * wh, ci)
            acc = acc + jnp.dot(patch, w[t * ci:(t + 1) * ci],
                                preferred_element_type=jnp.float32)
            t += 1
    return acc


def _store_out_and_stats(acc, y_ref, st_ref, tr, wh):
    """Write bf16 conv output + per-tile per-channel (sum, sumsq) partials (f32)."""
    co = acc.shape[-1]
    y_ref[0] = acc.reshape(tr, wh, co).astype(y_ref.dtype)
    s = jnp.sum(acc, axis=0, keepdims=True)            # (1, co)
    ss = jnp.sum(acc * acc, axis=0, keepdims=True)      # (1, co)
    st_ref[0, 0] = jnp.concatenate([s, ss], axis=0)     # (2, co)


# --------------------------------- kernels -----------------------------------

def _pool_conv_kernel(xm_ref, xt_ref, xb_ref, w_ref, y_ref, st_ref):
    """Phase 1: 2x2 max-pool + conv1 (no bias) + per-tile BN partial sums."""
    tr = xm_ref.shape[1] // 2
    wh = xm_ref.shape[2]
    ci = xm_ref.shape[3] // 2
    # halo (2 input rows = 1 pooled row) above and below the main 2*tr input rows
    rows = jnp.concatenate([xt_ref[0], xm_ref[0], xb_ref[0]], axis=0)   # (2tr+4, wh, 2ci)
    # W-pool: the two W partners are packed along lanes -> max of the two lane halves.
    rows = jnp.maximum(rows[..., :ci], rows[..., ci:])                   # (2tr+4, wh, ci)
    # H-pool: pairwise max along the leading (row) dim.
    pooled = jnp.max(rows.reshape(tr + 2, 2, wh, ci), axis=1)            # (tr+2, wh, ci)
    acc = _conv3x3_rows(pooled, w_ref[...], tr, wh, ci)                   # (tr*wh, co) f32
    _store_out_and_stats(acc, y_ref, st_ref, tr, wh)


def _bn_relu_conv_kernel(ym_ref, yt_ref, yb_ref, sc_ref, sh_ref, w_ref, y_ref, st_ref):
    """Phase 2: BN1 (folded scale/shift) + ReLU + conv2 (no bias) + BN2 partial sums."""
    tr = ym_ref.shape[1]
    wh = ym_ref.shape[2]
    ci = ym_ref.shape[3]
    rows = jnp.concatenate([yt_ref[0], ym_ref[0], yb_ref[0]], axis=0)    # (tr+2, wh, ci) bf16
    a = jnp.maximum(rows.astype(jnp.float32) * sc_ref[...] + sh_ref[...], 0.0)
    acc = _conv3x3_rows(a.astype(_BF16), w_ref[...], tr, wh, ci)
    _store_out_and_stats(acc, y_ref, st_ref, tr, wh)


def _bn_relu_kernel(y_ref, sc_ref, sh_ref, o_ref):
    """Phase 3: BN2 (folded scale/shift) + ReLU."""
    o_ref[0] = jnp.maximum(
        y_ref[0].astype(jnp.float32) * sc_ref[...] + sh_ref[...], 0.0
    ).astype(o_ref.dtype)


# ------------------------------- host helpers --------------------------------

def _pick_row_tile(hh, wh, c, max_rows=None, budget=_TILE_VMEM_BUDGET):
    """Largest row tile (divisor of hh) whose per-tile working set fits the VMEM budget.

    Working-set model (bytes) ~ 48 * tr * wh * c: double-buffered in/out blocks,
    W-padded tile, im2col patches (9x), f32 accumulator.  Weights are tile-invariant.
    """
    cap = hh if max_rows is None else min(hh, max_rows)
    best = 1
    for cand in range(1, cap + 1):
        if hh % cand == 0 and 48 * cand * wh * c <= budget:
            best = cand
    return best


def _fold_bn(partials, count, gamma, beta):
    """Fold grid-partial (sum, sumsq) into per-channel scale/shift (train-mode BN)."""
    tot = jnp.sum(partials, axis=(0, 1))                 # (2, C) f32
    mean = tot[0] / count
    var = tot[1] / count - mean * mean                   # biased batch variance
    scale = gamma.reshape(-1).astype(jnp.float32) * jax.lax.rsqrt(var + EPS)
    shift = beta.reshape(-1).astype(jnp.float32) - mean * scale
    return scale.reshape(1, -1), shift.reshape(1, -1)


# --------------------------------- wrapper ------------------------------------

@partial(jax.jit, static_argnames=("max_row_tile",))
def down_block(x_nhwc, params, *, max_row_tile=None):
    """DownBlock forward in NHWC.  params = (w1, g1, b1, w2, g2, b2) with HWIO weights."""
    w1, g1, be1, w2, g2, be2 = params
    N, H, W, Cin = x_nhwc.shape
    Hh, Wh = H // 2, W // 2
    Cout = w1.shape[-1]
    assert H % 2 == 0 and W % 2 == 0 and Hh >= 2 and Wh >= 2

    tr = _pick_row_tile(Hh, Wh, max(Cin, Cout), max_row_tile)
    R = Hh // tr

    # Free (view-only) relayout: pack the two W-pool partners into the lane dim.
    x_view = x_nhwc.astype(_BF16).reshape(N, H, Wh, 2 * Cin)
    # Flatten conv weights for the tap-folded contraction (tiny, one-time).
    w1m = w1.astype(_BF16).reshape(9 * Cin, Cout)
    w2m = w2.astype(_BF16).reshape(9 * Cout, Cout)

    cparams = pltpu.CompilerParams(
        dimension_semantics=("parallel", "parallel"),
        vmem_limit_bytes=_VMEM_LIMIT_BYTES,
    )

    # Reflect-aware halo row index maps (block index units: 1 pooled row per block).
    def top_map(n, i):
        return (n, jnp.where(i == 0, 1, i * tr - 1), 0, 0)

    def bot_map(n, i):
        return (n, jnp.where(i == R - 1, Hh - 2, i * tr + tr), 0, 0)

    def tile_map(n, i):
        return (n, i, 0, 0)

    def const_map(n, i):
        return (0, 0)

    # ---- Phase 1: pool + conv1 + BN1 partial stats --------------------------------
    y1, st1 = pl.pallas_call(
        _pool_conv_kernel,
        grid=(N, R),
        in_specs=[
            pl.BlockSpec((1, 2 * tr, Wh, 2 * Cin), tile_map),   # main rows (2 input rows / pooled row)
            pl.BlockSpec((1, 2, Wh, 2 * Cin), top_map),          # top halo (1 pooled row)
            pl.BlockSpec((1, 2, Wh, 2 * Cin), bot_map),          # bottom halo
            pl.BlockSpec((9 * Cin, Cout), const_map),            # weights: VMEM-resident
        ],
        out_specs=[
            pl.BlockSpec((1, tr, Wh, Cout), tile_map),
            pl.BlockSpec((1, 1, 2, Cout), tile_map),
        ],
        out_shape=[
            jax.ShapeDtypeStruct((N, Hh, Wh, Cout), _BF16),      # raw conv1 (pre-BN)
            jax.ShapeDtypeStruct((N, R, 2, Cout), jnp.float32),  # per-tile (sum, sumsq)
        ],
        compiler_params=cparams,
    )(x_view, x_view, x_view, w1m)

    sc1, sh1 = _fold_bn(st1, N * Hh * Wh, g1, be1)               # tiny XLA reduce

    # ---- Phase 2: BN1+ReLU + conv2 + BN2 partial stats -----------------------------
    y2, st2 = pl.pallas_call(
        _bn_relu_conv_kernel,
        grid=(N, R),
        in_specs=[
            pl.BlockSpec((1, tr, Wh, Cout), tile_map),
            pl.BlockSpec((1, 1, Wh, Cout), top_map),
            pl.BlockSpec((1, 1, Wh, Cout), bot_map),
            pl.BlockSpec((1, Cout), const_map),                  # folded BN1 scale
            pl.BlockSpec((1, Cout), const_map),                  # folded BN1 shift
            pl.BlockSpec((9 * Cout, Cout), const_map),
        ],
        out_specs=[
            pl.BlockSpec((1, tr, Wh, Cout), tile_map),
            pl.BlockSpec((1, 1, 2, Cout), tile_map),
        ],
        out_shape=[
            jax.ShapeDtypeStruct((N, Hh, Wh, Cout), _BF16),      # raw conv2 (pre-BN)
            jax.ShapeDtypeStruct((N, R, 2, Cout), jnp.float32),
        ],
        compiler_params=cparams,
    )(y1, y1, y1, sc1, sh1, w2m)

    sc2, sh2 = _fold_bn(st2, N * Hh * Wh, g2, be2)

    # ---- Phase 3: BN2 + ReLU --------------------------------------------------------
    out = pl.pallas_call(
        _bn_relu_kernel,
        grid=(N, R),
        in_specs=[
            pl.BlockSpec((1, tr, Wh, Cout), tile_map),
            pl.BlockSpec((1, Cout), const_map),
            pl.BlockSpec((1, Cout), const_map),
        ],
        out_specs=pl.BlockSpec((1, tr, Wh, Cout), tile_map),
        out_shape=jax.ShapeDtypeStruct((N, Hh, Wh, Cout), jnp.float32),
        compiler_params=cparams,
    )(y2, sc2, sh2)

    return out


# --------------------------- parameters & reference ---------------------------

def init_params(key, in_channels, out_channels):
    k1, k2 = jax.random.split(key, 2)
    s1 = 1.0 / jnp.sqrt(in_channels * 9.0)
    s2 = 1.0 / jnp.sqrt(out_channels * 9.0)
    w1 = jax.random.uniform(k1, (3, 3, in_channels, out_channels), jnp.float32, -s1, s1)
    w2 = jax.random.uniform(k2, (3, 3, out_channels, out_channels), jnp.float32, -s2, s2)
    # Conv biases are intentionally NOT created: train-mode BatchNorm's mean subtraction
    # cancels them exactly, so the forward output is unchanged without them.
    g1 = jnp.ones((out_channels,), jnp.float32)
    be1 = jnp.zeros((out_channels,), jnp.float32)
    g2 = jnp.ones((out_channels,), jnp.float32)
    be2 = jnp.zeros((out_channels,), jnp.float32)
    # TODO(synk): BatchNorm running_mean/var buffer updates (stateful training side
    # effects) are not modeled; forward uses batch stats like PyTorch train mode.
    return (w1, g1, be1, w2, g2, be2)


def reference(x_nhwc, params):
    """Pure-f32 JAX reference (no Pallas) matching PyTorch train-mode forward."""
    w1, g1, be1, w2, g2, be2 = params
    x = x_nhwc.astype(jnp.float32)
    N, H, W, C = x.shape
    pooled = x.reshape(N, H // 2, 2, W // 2, 2, C).max(axis=(2, 4))

    def conv(a, w):
        ap = jnp.pad(a, ((0, 0), (1, 1), (1, 1), (0, 0)), mode="reflect")
        return jax.lax.conv_general_dilated(
            ap, w.astype(jnp.float32), window_strides=(1, 1), padding="VALID",
            dimension_numbers=("NHWC", "HWIO", "NHWC"))

    def bn_relu(y, g, be):
        m = y.mean(axis=(0, 1, 2), keepdims=True)
        v = (y * y).mean(axis=(0, 1, 2), keepdims=True) - m * m
        return jnp.maximum((y - m) * jax.lax.rsqrt(v + EPS) * g + be, 0.0)

    y = bn_relu(conv(pooled, w1), g1, be1)
    y = bn_relu(conv(y, w2), g2, be2)
    return y


# ----------------------------------- main --------------------------------------

if __name__ == "__main__":
    key = jax.random.PRNGKey(0)

    # (N, Cin, Cout, H, W, max_row_tile): second config forces multiple row tiles so the
    # halo index_maps and the grid reduction of BN statistics are exercised.
    configs = [
        (2, 4, 8, 16, 16, None),
        (2, 4, 8, 32, 32, 4),
    ]

    for (N, Cin, Cout, H, W, max_rows) in configs:
        key, kx, kp = jax.random.split(key, 3)
        # The module is specified in NCHW; convert ONCE at the network boundary
        # (a full UNet port keeps everything NHWC, so no per-block transposes).
        x_nchw = jax.random.normal(kx, (N, Cin, H, W), jnp.float32)
        x_nhwc = jnp.transpose(x_nchw, (0, 2, 3, 1))
        params = init_params(kp, Cin, Cout)

        y = jax.block_until_ready(down_block(x_nhwc, params, max_row_tile=max_rows))
        assert y.shape == (N, H // 2, W // 2, Cout), y.shape

        y_ref = reference(x_nhwc, params)
        max_err = float(jnp.max(jnp.abs(y - y_ref)))
        # bf16 MXU operands + bf16 inter-stage activations vs. a pure-f32 reference.
        assert max_err < 5e-2, f"mismatch vs f32 reference: {max_err}"

    print("KERNEL_OK")
</pallas_src>

<mosaic_0001>
module attributes {stable_mosaic.version = 11 : i64} {
  func.func @_bn_relu_conv_kernel(%arg0: i32, %arg1: i32, %arg2: memref<1x8x8x8xbf16, #tpu.memory_space<vmem>>, %arg3: memref<1x1x8x8xbf16, #tpu.memory_space<vmem>>, %arg4: memref<1x1x8x8xbf16, #tpu.memory_space<vmem>>, %arg5: memref<1x8xf32, #tpu.memory_space<vmem>>, %arg6: memref<1x8xf32, #tpu.memory_space<vmem>>, %arg7: memref<72x8xbf16, #tpu.memory_space<vmem>>, %arg8: memref<1x8x8x8xbf16, #tpu.memory_space<vmem>>, %arg9: memref<1x1x2x8xf32, #tpu.memory_space<vmem>>) attributes {dimension_semantics = [#tpu.dimension_semantics<parallel>, #tpu.dimension_semantics<parallel>], iteration_bounds = array<i64: 2, 1>, scalar_prefetch = 0 : i64, scratch_operands = 0 : i64, tpu.core_type = #tpu.core_type<tc>, window_params = [{transform_indices = @transform_0, window_bounds = array<i64: 1, 8, 8, 8>}, {transform_indices = @transform_1, window_bounds = array<i64: 1, 1, 8, 8>}, {transform_indices = @transform_2, window_bounds = array<i64: 1, 1, 8, 8>}, {pipeline_mode = #tpu.pipeline_mode<synchronous>, transform_indices = @transform_3, window_bounds = array<i64: 1, 8>}, {pipeline_mode = #tpu.pipeline_mode<synchronous>, transform_indices = @transform_4, window_bounds = array<i64: 1, 8>}, {pipeline_mode = #tpu.pipeline_mode<synchronous>, transform_indices = @transform_5, window_bounds = array<i64: 72, 8>}, {transform_indices = @transform_6, window_bounds = array<i64: 1, 8, 8, 8>}, {transform_indices = @transform_7, window_bounds = array<i64: 1, 1, 2, 8>}]} {
    %c0 = arith.constant 0 : index
    %c0_0 = arith.constant 0 : index
    %c0_1 = arith.constant 0 : index
    %c0_2 = arith.constant 0 : index
    %0 = vector.load %arg3[%c0, %c0_0, %c0_1, %c0_2] : memref<1x1x8x8xbf16, #tpu.memory_space<vmem>>, vector<1x1x8x8xbf16>
    %1 = vector.shape_cast %0 : vector<1x1x8x8xbf16> to vector<1x8x8xbf16>
    %c0_3 = arith.constant 0 : index
    %c0_4 = arith.constant 0 : index
    %c0_5 = arith.constant 0 : index
    %c0_6 = arith.constant 0 : index
    %2 = vector.load %arg2[%c0_3, %c0_4, %c0_5, %c0_6] : memref<1x8x8x8xbf16, #tpu.memory_space<vmem>>, vector<1x8x8x8xbf16>
    %3 = vector.shape_cast %2 : vector<1x8x8x8xbf16> to vector<8x8x8xbf16>
    %c0_7 = arith.constant 0 : index
    %c0_8 = arith.constant 0 : index
    %c0_9 = arith.constant 0 : index
    %c0_10 = arith.constant 0 : index
    %4 = vector.load %arg4[%c0_7, %c0_8, %c0_9, %c0_10] : memref<1x1x8x8xbf16, #tpu.memory_space<vmem>>, vector<1x1x8x8xbf16>
    %5 = vector.shape_cast %4 : vector<1x1x8x8xbf16> to vector<1x8x8xbf16>
    %6 = tpu.concatenate %1, %3, %5 in 0 : vector<1x8x8xbf16>, vector<8x8x8xbf16>, vector<1x8x8xbf16> -> vector<10x8x8xbf16>
    %7 = arith.extf %6 : vector<10x8x8xbf16> to vector<10x8x8xf32>
    %c0_11 = arith.constant 0 : index
    %c0_12 = arith.constant 0 : index
    %8 = vector.load %arg5[%c0_11, %c0_12] : memref<1x8xf32, #tpu.memory_space<vmem>>, vector<1x8xf32>
    %9 = vector.shape_cast %8 : vector<1x8xf32> to vector<1x1x8xf32>
    %10 = vector.broadcast %9 : vector<1x1x8xf32> to vector<10x8x8xf32>
    %11 = arith.mulf %7, %10 : vector<10x8x8xf32>
    %c0_13 = arith.constant 0 : index
    %c0_14 = arith.constant 0 : index
    %12 = vector.load %arg6[%c0_13, %c0_14] : memref<1x8xf32, #tpu.memory_space<vmem>>, vector<1x8xf32>
    %13 = vector.shape_cast %12 : vector<1x8xf32> to vector<1x1x8xf32>
    %14 = vector.broadcast %13 : vector<1x1x8xf32> to vector<10x8x8xf32>
    %15 = arith.addf %11, %14 : vector<10x8x8xf32>
    %cst = arith.constant 0.000000e+00 : f32
    %16 = vector.broadcast %cst : f32 to vector<10x8x8xf32>
    %17 = arith.maximumf %15, %16 : vector<10x8x8xf32>
    %18 = arith.truncf %17 : vector<10x8x8xf32> to vector<10x8x8xbf16>
    %c0_15 = arith.constant 0 : index
    %c0_16 = arith.constant 0 : index
    %19 = vector.load %arg7[%c0_15, %c0_16] : memref<72x8xbf16, #tpu.memory_space<vmem>>, vector<72x8xbf16>
    %20 = vector.extract_strided_slice %18 {offsets = [0, 1, 0], sizes = [10, 1, 8], strides = [1, 1, 1]} : vector<10x8x8xbf16> to vector<10x1x8xbf16>
    %21 = vector.extract_strided_slice %18 {offsets = [0, 6, 0], sizes = [10, 1, 8], strides = [1, 1, 1]} : vector<10x8x8xbf16> to vector<10x1x8xbf16>
    %22 = tpu.concatenate %20, %18, %21 in 1 : vector<10x1x8xbf16>, vector<10x8x8xbf16>, vector<10x1x8xbf16> -> vector<10x10x8xbf16>
    %23 = vector.extract_strided_slice %22 {offsets = [0, 0, 0], sizes = [8, 8, 8], strides = [1, 1, 1]} : vector<10x10x8xbf16> to vector<8x8x8xbf16>
    %24 = vector.extract_strided_slice %22 {offsets = [0, 1, 0], sizes = [8, 8, 8], strides = [1, 1, 1]} : vector<10x10x8xbf16> to vector<8x8x8xbf16>
    %25 = vector.extract_strided_slice %22 {offsets = [0, 2, 0], sizes = [8, 8, 8], strides = [1, 1, 1]} : vector<10x10x8xbf16> to vector<8x8x8xbf16>
    %26 = vector.extract_strided_slice %22 {offsets = [1, 0, 0], sizes = [8, 8, 8], strides = [1, 1, 1]} : vector<10x10x8xbf16> to vector<8x8x8xbf16>
    %27 = vector.extract_strided_slice %22 {offsets = [1, 1, 0], sizes = [8, 8, 8], strides = [1, 1, 1]} : vector<10x10x8xbf16> to vector<8x8x8xbf16>
    %28 = vector.extract_strided_slice %22 {offsets = [1, 2, 0], sizes = [8, 8, 8], strides = [1, 1, 1]} : vector<10x10x8xbf16> to vector<8x8x8xbf16>
    %29 = vector.extract_strided_slice %22 {offsets = [2, 0, 0], sizes = [8, 8, 8], strides = [1, 1, 1]} : vector<10x10x8xbf16> to vector<8x8x8xbf16>
    %30 = vector.extract_strided_slice %22 {offsets = [2, 1, 0], sizes = [8, 8, 8], strides = [1, 1, 1]} : vector<10x10x8xbf16> to vector<8x8x8xbf16>
    %31 = vector.extract_strided_slice %22 {offsets = [2, 2, 0], sizes = [8, 8, 8], strides = [1, 1, 1]} : vector<10x10x8xbf16> to vector<8x8x8xbf16>
    %32 = tpu.concatenate %23, %24, %25, %26, %27, %28, %29, %30, %31 in 2 : vector<8x8x8xbf16>, vector<8x8x8xbf16>, vector<8x8x8xbf16>, vector<8x8x8xbf16>, vector<8x8x8xbf16>, vector<8x8x8xbf16>, vector<8x8x8xbf16>, vector<8x8x8xbf16>, vector<8x8x8xbf16> -> vector<8x8x72xbf16>
    %33 = vector.shape_cast %32 : vector<8x8x72xbf16> to vector<64x72xbf16>
    %cst_17 = arith.constant dense<0.000000e+00> : vector<64x8xf32>
    %34 = tpu.matmul %33, %19, %cst_17 {dimension_numbers = #tpu.dot_dimension_numbers<[1], [0], [0], [1], [0, 0, 1, 1], [], []>} : vector<64x72xbf16>, vector<72x8xbf16>, vector<64x8xf32> -> vector<64x8xf32>
    %35 = vector.shape_cast %34 : vector<64x8xf32> to vector<8x8x8xf32>
    %36 = arith.truncf %35 : vector<8x8x8xf32> to vector<8x8x8xbf16>
    %c0_18 = arith.constant 0 : index
    %c0_19 = arith.constant 0 : index
    %c0_20 = arith.constant 0 : index
    %c0_21 = arith.constant 0 : index
    %37 = vector.load %arg8[%c0_18, %c0_19, %c0_20, %c0_21] : memref<1x8x8x8xbf16, #tpu.memory_space<vmem>>, vector<1x8x8x8xbf16>
    %38 = vector.shape_cast %37 : vector<1x8x8x8xbf16> to vector<8x8x8xbf16>
    %39 = vector.shape_cast %36 : vector<8x8x8xbf16> to vector<1x8x8x8xbf16>
    tpu.vector_store %arg8[%c0_18, %c0_19, %c0_20, %c0_21], %39 {strides = array<i32>} : memref<1x8x8x8xbf16, #tpu.memory_space<vmem>>, vector<1x8x8x8xbf16>,
    %cst_22 = arith.constant dense<0.000000e+00> : vector<8xf32>
    %40 = vector.multi_reduction <add>, %34, %cst_22 [0] : vector<64x8xf32> to vector<8xf32>
    %41 = vector.shape_cast %40 : vector<8xf32> to vector<1x8xf32>
    %42 = arith.mulf %34, %34 : vector<64x8xf32>
    %cst_23 = arith.constant dense<0.000000e+00> : vector<8xf32>
    %43 = vector.multi_reduction <add>, %42, %cst_23 [0] : vector<64x8xf32> to vector<8xf32>
    %44 = vector.shape_cast %43 : vector<8xf32> to vector<1x8xf32>
    %45 = tpu.concatenate %41, %44 in 0 : vector<1x8xf32>, vector<1x8xf32> -> vector<2x8xf32>
    %c0_24 = arith.constant 0 : index
    %c0_25 = arith.constant 0 : index
    %c0_26 = arith.constant 0 : index
    %c0_27 = arith.constant 0 : index
    %46 = vector.load %arg9[%c0_24, %c0_25, %c0_26, %c0_27] : memref<1x1x2x8xf32, #tpu.memory_space<vmem>>, vector<1x1x2x8xf32>
    %47 = vector.shape_cast %46 : vector<1x1x2x8xf32> to vector<2x8xf32>
    %48 = vector.shape_cast %45 : vector<2x8xf32> to vector<1x1x2x8xf32>
    tpu.vector_store %arg9[%c0_24, %c0_25, %c0_26, %c0_27], %48 {strides = array<i32>} : memref<1x1x2x8xf32, #tpu.memory_space<vmem>>, vector<1x1x2x8xf32>,
    return
  }
  func.func @transform_0(%arg0: i32, %arg1: i32) -> (i32, i32, i32, i32) {
    %c0_i32 = arith.constant 0 : i32
    %c0_i32_0 = arith.constant 0 : i32
    %c0_i32_1 = arith.constant 0 : i32
    return %arg0, %arg1, %c0_i32, %c0_i32_0 : i32, i32, i32, i32
  }
  func.func @transform_1(%arg0: i32, %arg1: i32) -> (i32, i32, i32, i32) {
    %c0_i32 = arith.constant 0 : i32
    %0 = arith.cmpi eq, %arg1, %c0_i32 : i32
    %c8_i32 = arith.constant 8 : i32
    %1 = arith.muli %arg1, %c8_i32 : i32
    %c1_i32 = arith.constant 1 : i32
    %2 = arith.subi %1, %c1_i32 : i32
    %c1_i32_0 = arith.constant 1 : i32
    %3 = arith.select %0, %c1_i32_0, %2 : i32
    %c0_i32_1 = arith.constant 0 : i32
    %c0_i32_2 = arith.constant 0 : i32
    %c0_i32_3 = arith.constant 0 : i32
    return %arg0, %3, %c0_i32_1, %c0_i32_2 : i32, i32, i32, i32
  }
  func.func @transform_2(%arg0: i32, %arg1: i32) -> (i32, i32, i32, i32) {
    %c0_i32 = arith.constant 0 : i32
    %0 = arith.cmpi eq, %arg1, %c0_i32 : i32
    %c8_i32 = arith.constant 8 : i32
    %1 = arith.muli %arg1, %c8_i32 : i32
    %c8_i32_0 = arith.constant 8 : i32
    %2 = arith.addi %1, %c8_i32_0 : i32
    %c6_i32 = arith.constant 6 : i32
    %3 = arith.select %0, %c6_i32, %2 : i32
    %c0_i32_1 = arith.constant 0 : i32
    %c0_i32_2 = arith.constant 0 : i32
    %c0_i32_3 = arith.constant 0 : i32
    return %arg0, %3, %c0_i32_1, %c0_i32_2 : i32, i32, i32, i32
  }
  func.func @transform_3(%arg0: i32, %arg1: i32) -> (i32, i32) {
    %c0_i32 = arith.constant 0 : i32
    %c0_i32_0 = arith.constant 0 : i32
    %c0_i32_1 = arith.constant 0 : i32
    return %c0_i32, %c0_i32_0 : i32, i32
  }
  func.func @transform_4(%arg0: i32, %arg1: i32) -> (i32, i32) {
    %c0_i32 = arith.constant 0 : i32
    %c0_i32_0 = arith.constant 0 : i32
    %c0_i32_1 = arith.constant 0 : i32
    return %c0_i32, %c0_i32_0 : i32, i32
  }
  func.func @transform_5(%arg0: i32, %arg1: i32) -> (i32, i32) {
    %c0_i32 = arith.constant 0 : i32
    %c0_i32_0 = arith.constant 0 : i32
    %c0_i32_1 = arith.constant 0 : i32
    return %c0_i32, %c0_i32_0 : i32, i32
  }
  func.func @transform_6(%arg0: i32, %arg1: i32) -> (i32, i32, i32, i32) {
    %c0_i32 = arith.constant 0 : i32
    %c0_i32_0 = arith.constant 0 : i32
    %c0_i32_1 = arith.constant 0 : i32
    return %arg0, %arg1, %c0_i32, %c0_i32_0 : i32, i32, i32, i32
  }
  func.func @transform_7(%arg0: i32, %arg1: i32) -> (i32, i32, i32, i32) {
    %c0_i32 = arith.constant 0 : i32
    %c0_i32_0 = arith.constant 0 : i32
    %c0_i32_1 = arith.constant 0 : i32
    return %arg0, %arg1, %c0_i32, %c0_i32_0 : i32, i32, i32, i32
  }
}

module attributes {stable_mosaic.version = 11 : i64} {
  func.func @_pool_conv_kernel(%arg0: i32, %arg1: i32, %arg2: memref<1x16x8x8xbf16, #tpu.memory_space<vmem>>, %arg3: memref<1x2x8x8xbf16, #tpu.memory_space<vmem>>, %arg4: memref<1x2x8x8xbf16, #tpu.memory_space<vmem>>, %arg5: memref<36x8xbf16, #tpu.memory_space<vmem>>, %arg6: memref<1x8x8x8xbf16, #tpu.memory_space<vmem>>, %arg7: memref<1x1x2x8xf32, #tpu.memory_space<vmem>>) attributes {dimension_semantics = [#tpu.dimension_semantics<parallel>, #tpu.dimension_semantics<parallel>], iteration_bounds = array<i64: 2, 1>, scalar_prefetch = 0 : i64, scratch_operands = 0 : i64, tpu.core_type = #tpu.core_type<tc>, window_params = [{transform_indices = @transform_0, window_bounds = array<i64: 1, 16, 8, 8>}, {transform_indices = @transform_1, window_bounds = array<i64: 1, 2, 8, 8>}, {transform_indices = @transform_2, window_bounds = array<i64: 1, 2, 8, 8>}, {pipeline_mode = #tpu.pipeline_mode<synchronous>, transform_indices = @transform_3, window_bounds = array<i64: 36, 8>}, {transform_indices = @transform_4, window_bounds = array<i64: 1, 8, 8, 8>}, {transform_indices = @transform_5, window_bounds = array<i64: 1, 1, 2, 8>}]} {
    %c0 = arith.constant 0 : index
    %c0_0 = arith.constant 0 : index
    %c0_1 = arith.constant 0 : index
    %c0_2 = arith.constant 0 : index
    %0 = vector.load %arg3[%c0, %c0_0, %c0_1, %c0_2] : memref<1x2x8x8xbf16, #tpu.memory_space<vmem>>, vector<1x2x8x8xbf16>
    %1 = vector.shape_cast %0 : vector<1x2x8x8xbf16> to vector<2x8x8xbf16>
    %c0_3 = arith.constant 0 : index
    %c0_4 = arith.constant 0 : index
    %c0_5 = arith.constant 0 : index
    %c0_6 = arith.constant 0 : index
    %2 = vector.load %arg2[%c0_3, %c0_4, %c0_5, %c0_6] : memref<1x16x8x8xbf16, #tpu.memory_space<vmem>>, vector<1x16x8x8xbf16>
    %3 = vector.shape_cast %2 : vector<1x16x8x8xbf16> to vector<16x8x8xbf16>
    %c0_7 = arith.constant 0 : index
    %c0_8 = arith.constant 0 : index
    %c0_9 = arith.constant 0 : index
    %c0_10 = arith.constant 0 : index
    %4 = vector.load %arg4[%c0_7, %c0_8, %c0_9, %c0_10] : memref<1x2x8x8xbf16, #tpu.memory_space<vmem>>, vector<1x2x8x8xbf16>
    %5 = vector.shape_cast %4 : vector<1x2x8x8xbf16> to vector<2x8x8xbf16>
    %6 = tpu.concatenate %1, %3, %5 in 0 : vector<2x8x8xbf16>, vector<16x8x8xbf16>, vector<2x8x8xbf16> -> vector<20x8x8xbf16>
    %7 = vector.extract_strided_slice %6 {offsets = [0, 0, 0], sizes = [20, 8, 4], strides = [1, 1, 1]} : vector<20x8x8xbf16> to vector<20x8x4xbf16>
    %8 = vector.extract_strided_slice %6 {offsets = [0, 0, 4], sizes = [20, 8, 4], strides = [1, 1, 1]} : vector<20x8x8xbf16> to vector<20x8x4xbf16>
    %9 = arith.maximumf %7, %8 : vector<20x8x4xbf16>
    %10 = vector.shape_cast %9 : vector<20x8x4xbf16> to vector<10x2x8x4xbf16>
    %cst = arith.constant dense<0xFF80> : vector<10x8x4xbf16>
    %11 = vector.multi_reduction <maximumf>, %10, %cst [1] : vector<10x2x8x4xbf16> to vector<10x8x4xbf16>
    %c0_11 = arith.constant 0 : index
    %c0_12 = arith.constant 0 : index
    %12 = vector.load %arg5[%c0_11, %c0_12] : memref<36x8xbf16, #tpu.memory_space<vmem>>, vector<36x8xbf16>
    %13 = vector.extract_strided_slice %11 {offsets = [0, 1, 0], sizes = [10, 1, 4], strides = [1, 1, 1]} : vector<10x8x4xbf16> to vector<10x1x4xbf16>
    %14 = vector.extract_strided_slice %11 {offsets = [0, 6, 0], sizes = [10, 1, 4], strides = [1, 1, 1]} : vector<10x8x4xbf16> to vector<10x1x4xbf16>
    %15 = tpu.concatenate %13, %11, %14 in 1 : vector<10x1x4xbf16>, vector<10x8x4xbf16>, vector<10x1x4xbf16> -> vector<10x10x4xbf16>
    %16 = vector.extract_strided_slice %15 {offsets = [0, 0, 0], sizes = [8, 8, 4], strides = [1, 1, 1]} : vector<10x10x4xbf16> to vector<8x8x4xbf16>
    %17 = vector.extract_strided_slice %15 {offsets = [0, 1, 0], sizes = [8, 8, 4], strides = [1, 1, 1]} : vector<10x10x4xbf16> to vector<8x8x4xbf16>
    %18 = vector.extract_strided_slice %15 {offsets = [0, 2, 0], sizes = [8, 8, 4], strides = [1, 1, 1]} : vector<10x10x4xbf16> to vector<8x8x4xbf16>
    %19 = vector.extract_strided_slice %15 {offsets = [1, 0, 0], sizes = [8, 8, 4], strides = [1, 1, 1]} : vector<10x10x4xbf16> to vector<8x8x4xbf16>
    %20 = vector.extract_strided_slice %15 {offsets = [1, 1, 0], sizes = [8, 8, 4], strides = [1, 1, 1]} : vector<10x10x4xbf16> to vector<8x8x4xbf16>
    %21 = vector.extract_strided_slice %15 {offsets = [1, 2, 0], sizes = [8, 8, 4], strides = [1, 1, 1]} : vector<10x10x4xbf16> to vector<8x8x4xbf16>
    %22 = vector.extract_strided_slice %15 {offsets = [2, 0, 0], sizes = [8, 8, 4], strides = [1, 1, 1]} : vector<10x10x4xbf16> to vector<8x8x4xbf16>
    %23 = vector.extract_strided_slice %15 {offsets = [2, 1, 0], sizes = [8, 8, 4], strides = [1, 1, 1]} : vector<10x10x4xbf16> to vector<8x8x4xbf16>
    %24 = vector.extract_strided_slice %15 {offsets = [2, 2, 0], sizes = [8, 8, 4], strides = [1, 1, 1]} : vector<10x10x4xbf16> to vector<8x8x4xbf16>
    %25 = tpu.concatenate %16, %17, %18, %19, %20, %21, %22, %23, %24 in 2 : vector<8x8x4xbf16>, vector<8x8x4xbf16>, vector<8x8x4xbf16>, vector<8x8x4xbf16>, vector<8x8x4xbf16>, vector<8x8x4xbf16>, vector<8x8x4xbf16>, vector<8x8x4xbf16>, vector<8x8x4xbf16> -> vector<8x8x36xbf16>
    %26 = vector.shape_cast %25 : vector<8x8x36xbf16> to vector<64x36xbf16>
    %cst_13 = arith.constant dense<0.000000e+00> : vector<64x8xf32>
    %27 = tpu.matmul %26, %12, %cst_13 {dimension_numbers = #tpu.dot_dimension_numbers<[1], [0], [0], [1], [0, 0, 1, 1], [], []>} : vector<64x36xbf16>, vector<36x8xbf16>, vector<64x8xf32> -> vector<64x8xf32>
    %28 = vector.shape_cast %27 : vector<64x8xf32> to vector<8x8x8xf32>
    %29 = arith.truncf %28 : vector<8x8x8xf32> to vector<8x8x8xbf16>
    %c0_14 = arith.constant 0 : index
    %c0_15 = arith.constant 0 : index
    %c0_16 = arith.constant 0 : index
    %c0_17 = arith.constant 0 : index
    %30 = vector.load %arg6[%c0_14, %c0_15, %c0_16, %c0_17] : memref<1x8x8x8xbf16, #tpu.memory_space<vmem>>, vector<1x8x8x8xbf16>
    %31 = vector.shape_cast %30 : vector<1x8x8x8xbf16> to vector<8x8x8xbf16>
    %32 = vector.shape_cast %29 : vector<8x8x8xbf16> to vector<1x8x8x8xbf16>
    tpu.vector_store %arg6[%c0_14, %c0_15, %c0_16, %c0_17], %32 {strides = array<i32>} : memref<1x8x8x8xbf16, #tpu.memory_space<vmem>>, vector<1x8x8x8xbf16>,
    %cst_18 = arith.constant dense<0.000000e+00> : vector<8xf32>
    %33 = vector.multi_reduction <add>, %27, %cst_18 [0] : vector<64x8xf32> to vector<8xf32>
    %34 = vector.shape_cast %33 : vector<8xf32> to vector<1x8xf32>
    %35 = arith.mulf %27, %27 : vector<64x8xf32>
    %cst_19 = arith.constant dense<0.000000e+00> : vector<8xf32>
    %36 = vector.multi_reduction <add>, %35, %cst_19 [0] : vector<64x8xf32> to vector<8xf32>
    %37 = vector.shape_cast %36 : vector<8xf32> to vector<1x8xf32>
    %38 = tpu.concatenate %34, %37 in 0 : vector<1x8xf32>, vector<1x8xf32> -> vector<2x8xf32>
    %c0_20 = arith.constant 0 : index
    %c0_21 = arith.constant 0 : index
    %c0_22 = arith.constant 0 : index
    %c0_23 = arith.constant 0 : index
    %39 = vector.load %arg7[%c0_20, %c0_21, %c0_22, %c0_23] : memref<1x1x2x8xf32, #tpu.memory_space<vmem>>, vector<1x1x2x8xf32>
    %40 = vector.shape_cast %39 : vector<1x1x2x8xf32> to vector<2x8xf32>
    %41 = vector.shape_cast %38 : vector<2x8xf32> to vector<1x1x2x8xf32>
    tpu.vector_store %arg7[%c0_20, %c0_21, %c0_22, %c0_23], %41 {strides = array<i32>} : memref<1x1x2x8xf32, #tpu.memory_space<vmem>>, vector<1x1x2x8xf32>,
    return
  }
  func.func @transform_0(%arg0: i32, %arg1: i32) -> (i32, i32, i32, i32) {
    %c0_i32 = arith.constant 0 : i32
    %c0_i32_0 = arith.constant 0 : i32
    %c0_i32_1 = arith.constant 0 : i32
    return %arg0, %arg1, %c0_i32, %c0_i32_0 : i32, i32, i32, i32
  }
  func.func @transform_1(%arg0: i32, %arg1: i32) -> (i32, i32, i32, i32) {
    %c0_i32 = arith.constant 0 : i32
    %0 = arith.cmpi eq, %arg1, %c0_i32 : i32
    %c8_i32 = arith.constant 8 : i32
    %1 = arith.muli %arg1, %c8_i32 : i32
    %c1_i32 = arith.constant 1 : i32
    %2 = arith.subi %1, %c1_i32 : i32
    %c1_i32_0 = arith.constant 1 : i32
    %3 = arith.select %0, %c1_i32_0, %2 : i32
    %c0_i32_1 = arith.constant 0 : i32
    %c0_i32_2 = arith.constant 0 : i32
    %c0_i32_3 = arith.constant 0 : i32
    return %arg0, %3, %c0_i32_1, %c0_i32_2 : i32, i32, i32, i32
  }
  func.func @transform_2(%arg0: i32, %arg1: i32) -> (i32, i32, i32, i32) {
    %c0_i32 = arith.constant 0 : i32
    %0 = arith.cmpi eq, %arg1, %c0_i32 : i32
    %c8_i32 = arith.constant 8 : i32
    %1 = arith.muli %arg1, %c8_i32 : i32
    %c8_i32_0 = arith.constant 8 : i32
    %2 = arith.addi %1, %c8_i32_0 : i32
    %c6_i32 = arith.constant 6 : i32
    %3 = arith.select %0, %c6_i32, %2 : i32
    %c0_i32_1 = arith.constant 0 : i32
    %c0_i32_2 = arith.constant 0 : i32
    %c0_i32_3 = arith.constant 0 : i32
    return %arg0, %3, %c0_i32_1, %c0_i32_2 : i32, i32, i32, i32
  }
  func.func @transform_3(%arg0: i32, %arg1: i32) -> (i32, i32) {
    %c0_i32 = arith.constant 0 : i32
    %c0_i32_0 = arith.constant 0 : i32
    %c0_i32_1 = arith.constant 0 : i32
    return %c0_i32, %c0_i32_0 : i32, i32
  }
  func.func @transform_4(%arg0: i32, %arg1: i32) -> (i32, i32, i32, i32) {
    %c0_i32 = arith.constant 0 : i32
    %c0_i32_0 = arith.constant 0 : i32
    %c0_i32_1 = arith.constant 0 : i32
    return %arg0, %arg1, %c0_i32, %c0_i32_0 : i32, i32, i32, i32
  }
  func.func @transform_5(%arg0: i32, %arg1: i32) -> (i32, i32, i32, i32) {
    %c0_i32 = arith.constant 0 : i32
    %c0_i32_0 = arith.constant 0 : i32
    %c0_i32_1 = arith.constant 0 : i32
    return %arg0, %arg1, %c0_i32, %c0_i32_0 : i32, i32, i32, i32
  }
}

module attributes {stable_mosaic.version = 11 : i64} {
  func.func @_bn_relu_kernel(%arg0: i32, %arg1: i32, %arg2: memref<1x8x8x8xbf16, #tpu.memory_space<vmem>>, %arg3: memref<1x8xf32, #tpu.memory_space<vmem>>, %arg4: memref<1x8xf32, #tpu.memory_space<vmem>>, %arg5: memref<1x8x8x8xf32, #tpu.memory_space<vmem>>) attributes {dimension_semantics = [#tpu.dimension_semantics<parallel>, #tpu.dimension_semantics<parallel>], iteration_bounds = array<i64: 2, 1>, scalar_prefetch = 0 : i64, scratch_operands = 0 : i64, tpu.core_type = #tpu.core_type<tc>, window_params = [{transform_indices = @transform_0, window_bounds = array<i64: 1, 8, 8, 8>}, {pipeline_mode = #tpu.pipeline_mode<synchronous>, transform_indices = @transform_1, window_bounds = array<i64: 1, 8>}, {pipeline_mode = #tpu.pipeline_mode<synchronous>, transform_indices = @transform_2, window_bounds = array<i64: 1, 8>}, {transform_indices = @transform_3, window_bounds = array<i64: 1, 8, 8, 8>}]} {
    %c0 = arith.constant 0 : index
    %c0_0 = arith.constant 0 : index
    %c0_1 = arith.constant 0 : index
    %c0_2 = arith.constant 0 : index
    %0 = vector.load %arg2[%c0, %c0_0, %c0_1, %c0_2] : memref<1x8x8x8xbf16, #tpu.memory_space<vmem>>, vector<1x8x8x8xbf16>
    %1 = vector.shape_cast %0 : vector<1x8x8x8xbf16> to vector<8x8x8xbf16>
    %2 = arith.extf %1 : vector<8x8x8xbf16> to vector<8x8x8xf32>
    %c0_3 = arith.constant 0 : index
    %c0_4 = arith.constant 0 : index
    %3 = vector.load %arg3[%c0_3, %c0_4] : memref<1x8xf32, #tpu.memory_space<vmem>>, vector<1x8xf32>
    %4 = vector.shape_cast %3 : vector<1x8xf32> to vector<1x1x8xf32>
    %5 = vector.broadcast %4 : vector<1x1x8xf32> to vector<8x8x8xf32>
    %6 = arith.mulf %2, %5 : vector<8x8x8xf32>
    %c0_5 = arith.constant 0 : index
    %c0_6 = arith.constant 0 : index
    %7 = vector.load %arg4[%c0_5, %c0_6] : memref<1x8xf32, #tpu.memory_space<vmem>>, vector<1x8xf32>
    %8 = vector.shape_cast %7 : vector<1x8xf32> to vector<1x1x8xf32>
    %9 = vector.broadcast %8 : vector<1x1x8xf32> to vector<8x8x8xf32>
    %10 = arith.addf %6, %9 : vector<8x8x8xf32>
    %cst = arith.constant 0.000000e+00 : f32
    %11 = vector.broadcast %cst : f32 to vector<8x8x8xf32>
    %12 = arith.maximumf %10, %11 : vector<8x8x8xf32>
    %c0_7 = arith.constant 0 : index
    %c0_8 = arith.constant 0 : index
    %c0_9 = arith.constant 0 : index
    %c0_10 = arith.constant 0 : index
    %13 = vector.load %arg5[%c0_7, %c0_8, %c0_9, %c0_10] : memref<1x8x8x8xf32, #tpu.memory_space<vmem>>, vector<1x8x8x8xf32>
    %14 = vector.shape_cast %13 : vector<1x8x8x8xf32> to vector<8x8x8xf32>
    %15 = vector.shape_cast %12 : vector<8x8x8xf32> to vector<1x8x8x8xf32>
    tpu.vector_store %arg5[%c0_7, %c0_8, %c0_9, %c0_10], %15 {strides = array<i32>} : memref<1x8x8x8xf32, #tpu.memory_space<vmem>>, vector<1x8x8x8xf32>,
    return
  }
  func.func @transform_0(%arg0: i32, %arg1: i32) -> (i32, i32, i32, i32) {
    %c0_i32 = arith.constant 0 : i32
    %c0_i32_0 = arith.constant 0 : i32
    %c0_i32_1 = arith.constant 0 : i32
    return %arg0, %arg1, %c0_i32, %c0_i32_0 : i32, i32, i32, i32
  }
  func.func @transform_1(%arg0: i32, %arg1: i32) -> (i32, i32) {
    %c0_i32 = arith.constant 0 : i32
    %c0_i32_0 = arith.constant 0 : i32
    %c0_i32_1 = arith.constant 0 : i32
    return %c0_i32, %c0_i32_0 : i32, i32
  }
  func.func @transform_2(%arg0: i32, %arg1: i32) -> (i32, i32) {
    %c0_i32 = arith.constant 0 : i32
    %c0_i32_0 = arith.constant 0 : i32
    %c0_i32_1 = arith.constant 0 : i32
    return %c0_i32, %c0_i32_0 : i32, i32
  }
  func.func @transform_3(%arg0: i32, %arg1: i32) -> (i32, i32, i32, i32) {
    %c0_i32 = arith.constant 0 : i32
    %c0_i32_0 = arith.constant 0 : i32
    %c0_i32_1 = arith.constant 0 : i32
    return %arg0, %arg1, %c0_i32, %c0_i32_0 : i32, i32, i32, i32
  }
}

</mosaic_0001>

<bundles_post_ra>
// kernel: down_block.5
= control target key start
LH: loop header
LB: loop body
LE: loop exit
PB: predicated region body
PF: predicated region fallthrough
CT: control target
= control target key end

     0   :  { %8 = vsyncpa [#allocation3], 0  ;;  %s698_s0 = inlined_call_operand.vmem [shape: bf16[2,8,8,8], index: 0, kind: input, shape index: {}]   ;;  %s699_s1 = inlined_call_operand.vmem [shape: f32[1,8], index: 1, kind: input, shape index: {}]   ;;  %s700_s2 = inlined_call_operand.vmem [shape: f32[1,8], index: 2, kind: input, shape index: {}]   ;;  %s701_s3 = inlined_call_operand.hbm [shape: f32[2,8,8,8], index: 3, kind: output, shape index: {}]  }
   0x1   :  { %10 = vsyncpa [#allocation3 + $0x1], 0  ;;  %s554_s12 = smov 0   ;;  %s556_s13 = smov 0  }
   0x2   :  { %s558_s14 = smov 0   ;;  %s560_s15 = smov 0  }
   0x3   :  { %s562_s16 = smov 0   ;;  %s564_s17 = smov 0  }
   0x4 LB: > { %s358_s18 = sadd.s32 4294967295, %s529_s17   ;;  %s359_s19 = sadd.s32 4294967294, %s529_s17   ;;  %s529_s17 = sphi %s564_s17, %s16_s17   ;;  %s525_s16 = sphi %s562_s16, %s708_s16   ;;  %s521_s15 = sphi %s560_s15, %s707_s15   ;;  %s517_s14 = sphi %s558_s14, %s706_s14   ;;  %s513_s13 = sphi %s556_s13, %s705_s13   ;;  %s509_s12 = sphi %s554_s12, %s704_s12  }
   0x5   : > { %s28_s20 = sadd.s32 1, %s525_s16  ;;  %s107_s21 = sadd.s32 1, %s517_s14 }
   0x6   : > { %p30_p0 = scmp.ge.s32.totalorder %s28_s20, 2  ;;  %p117_p1 = scmp.ne.s32.totalorder %s517_s14, %s513_s13 }
   0x7   : > { %p118_p2 = scmp.eq.s32.totalorder %s358_s18, 1  ;;  %p123_p3 = scmp.ne.s32.totalorder %s513_s13, %s509_s12 }
   0x8   : > { %s710_s20 = smov (%p30_p0, %s28_s20), 0  ;;  %p124_p5 = scmp.eq.s32.totalorder %s359_s19, 1 }
   0x9   : > { %p594_p4 = por %p118_p2, %p117_p1  ;;  %s102_s23 = ssub.s32 %s525_s16, %s710_s20 }
   0xa   : > { %p362_p6 = scmp.ge.s32.totalorder %s529_s17, 1  ;;  %p105_p7 = scmp.eq.s32.totalorder %s102_s23, 0 }
   0xb   : > { %p601_p8 = por %p124_p5, %p123_p3  ;;  %p161_p9 = scmp.lt.s32.totalorder %s529_s17, 3 }
   0xc   : > { %s607_s25 = scalar_select %p105_p7, %s517_s14, %s107_s21  }
   0xd   : > { %p162_p10 = pnand %p362_p6, %p161_p9 }
   0xe   : > { %p190_p11 = scmp.lt.s32.totalorder (!%p162_p10), %s521_s15, 1  ;;  %s186_s26 = sand.u32 (!%p162_p10), 1, %s513_s13   ;;  %v366_v0 = vld [vmem:[%s699_s1] ss:$0 sm:$0xff] (!%p162_p10)  ;;  %vm254_vm0 = vcmask (!%p162_p10), 64512  }
   0xf   : > { %165 = sbr.rel (%p162_p10) target bundleno = 53 (0x35), region = 32  ;;  %s363_s28 = sshll.u32 (!%p162_p10), %s186_s26, 6  ;;  %v367_v9 = vld [vmem:[%s700_s2] ss:$0 sm:$0xff] (!%p162_p10) }
  0x10   : > { %s623_s10 = scalar_lea.vmem (!%p162_p10), [#allocation2], %s363_s28  ;;  %s374_s18 = sshll.u32 (!%p162_p10), %s521_s15, 10 }
  0x11   : > { %s279_s11 = sshll.u32 (!%p162_p10), %s623_s10, 4  ;;  %s632_s21 = scalar_lea.hbm (!%p162_p10), %s701_s3, %s374_s18  ;;  %s627_s11 = int_to_ptr.vmem [resolvable:$true] %s279_s11 }
  0x12   : > { %s652_s23 = scalar_lea.sflag (!%p162_p10), [#allocation3], %s186_s26  ;;  %s531_s28 = smov (!%p162_p10), [#allocation2]  }
  0x16   : > { %s191_s27 = scalar_select %p190_p11, %s521_s15, 1 }
  0x18   : > { %s373_s29 = sshll.u32 %s191_s27, 5  ;;  %s451_s27 = scalar_lea.vmem %s627_s11, 1024 }
  0x19   : > { %s197_s5 = scalar_lea.vmem %s698_s0, %s373_s29  ;;  %p452_p12 = scmp.ne.s32.totalorder %s627_s11, %s451_s27 }
  0x1a   : > { %v376_v1 = vld [vmem:[%s197_s5] sm:$0xff]   ;;  %v391_v2 = vld [vmem:[%s197_s5 + $0x8] sm:$0xff]   ;;  %v392_v3 = vld [vmem:[%s197_s5 + $0x10] sm:$0xff]   ;;  %s455_s29 = sshll.u32 %s531_s28, 4  ;;  %s456_s29 = int_to_ptr.vmem [resolvable:$false] %s455_s29 }
  0x1b   : > { %v377_v4 = vunpack.c.l.bf16 %v376_v1  ;;  %v378_v5 = vunpack.c.h.bf16 %v376_v1  ;;  %v381_v6 = vunpack.c.l.bf16 %v391_v2  ;;  %v382_v7 = vunpack.c.h.bf16 %v391_v2  ;;  %v393_v8 = vld [vmem:[%s197_s5 + $0x18] sm:$0xff]   ;;  %p453_p13 = pnand %p452_p12, %p594_p4  ;;  %s457_s30 = scalar_lea.vmem %s456_s29, 2048 }
  0x1c   : > { %v385_v10 = vunpack.c.l.bf16 %v392_v3  ;;  %v386_v11 = vunpack.c.h.bf16 %v392_v3  ;;  %v389_v12 = vunpack.c.l.bf16 %v393_v8  ;;  %v390_v13 = vunpack.c.h.bf16 %v393_v8  ;;  %p458_p1 = scmp.lt.s32.totalorder %s627_s11, %s456_s29  ;;  %p459_p2 = scmp.lt.s32.totalorder %s457_s30, %s451_s27 }
  0x1d   : > { %v223_v14 = vmul.f32 %v377_v4, %v366_v0  ;;  %v224_v15 = vmul.f32 %v378_v5, %v366_v0  ;;  %v225_v16 = vmul.f32 %v381_v6, %v366_v0  ;;  %v226_v17 = vmul.f32 %v382_v7, %v366_v0  ;;  %p454_p0 = pneg %p453_p13 }
  0x1e   : > { %v227_v18 = vmul.f32 %v385_v10, %v366_v0  ;;  %v228_v19 = vmul.f32 %v386_v11, %v366_v0  ;;  %v229_v20 = vmul.f32 %v389_v12, %v366_v0  ;;  %v230_v21 = vmul.f32 %v390_v13, %v366_v0  ;;  %p460_p3 = por %p459_p2, %p458_p1 }
  0x1f   : > { %v238_v22 = vadd.f32 %v367_v9, %v223_v14  ;;  %v239_v23 = vadd.f32 %v367_v9, %v224_v15  ;;  %v240_v24 = vadd.f32 %v367_v9, %v225_v16  ;;  %v241_v25 = vadd.f32 %v367_v9, %v226_v17 }
  0x20   : > { %v242_v26 = vadd.f32 %v367_v9, %v227_v18  ;;  %v243_v27 = vadd.f32 %v367_v9, %v228_v19  ;;  %v244_v28 = vadd.f32 %v367_v9, %v229_v20  ;;  %v245_v29 = vadd.f32 %v367_v9, %v230_v21  ;;  %p461_p5 = pnand %p460_p3, %p454_p0 }
  0x21   : > { %v246_v30 = vmax.f32 %v238_v22, 0.0  ;;  %v247_v31 = vmax.f32 %v239_v23, 0.0  ;;  %v248_v32 = vmax.f32 %v240_v24, 0.0  ;;  %v249_v33 = vmax.f32 %v241_v25, 0.0 }
  0x22   : > { %v250_v34 = vmax.f32 %v242_v26, 0.0  ;;  %v251_v35 = vmax.f32 %v243_v27, 0.0  ;;  %v252_v36 = vmax.f32 %v244_v28, 0.0  ;;  %v253_v37 = vmax.f32 %v245_v29, 0.0 }
  0x23   : > { %255 = vst.msk [vmem:[%s623_s10] sm:$0xff] %vm254_vm0, %v246_v30  ;;  %256 = vst.msk [vmem:[%s623_s10 + $0x8] sm:$0xff] %vm254_vm0, %v247_v31 }
  0x24   : > { %257 = vst.msk [vmem:[%s623_s10 + $0x10] sm:$0xff] %vm254_vm0, %v248_v32  ;;  %258 = vst.msk [vmem:[%s623_s10 + $0x18] sm:$0xff] %vm254_vm0, %v249_v33 }
  0x25   : > { %259 = vst.msk [vmem:[%s623_s10 + $0x20] sm:$0xff] %vm254_vm0, %v250_v34  ;;  %260 = vst.msk [vmem:[%s623_s10 + $0x28] sm:$0xff] %vm254_vm0, %v251_v35 }
  0x26   : > { %261 = vst.msk [vmem:[%s623_s10 + $0x30] sm:$0xff] %vm254_vm0, %v252_v36  ;;  %262 = vst.msk [vmem:[%s623_s10 + $0x38] sm:$0xff] %vm254_vm0, %v253_v37 }
  0x27   : > { %464 = shalt.err (!%p461_p5)
}
  0x28   : > { %s465_s26 = scalar_lea.hbm %s632_s21, 1024  ;;  %s469_s6 = scalar_lea.hbm %s701_s3, 2048 }
  0x29   : > { %p466_p6 = scmp.ne.s32.totalorder %s632_s21, %s465_s26  ;;  %p470_p10 = scmp.lt.u32.totalorder %s632_s21, %s701_s3 }
  0x2a   : > { %p471_p11 = scmp.lt.u32.totalorder %s469_s6, %s465_s26  ;;  %p473_p13 = scmp.lt.u32.totalorder %s465_s26, %s632_s21 }
  0x2b   : > { %p467_p7 = pnand %p466_p6, %p594_p4 }
  0x2c   : > { %p472_p12 = por %p471_p11, %p470_p10 }
  0x2d   : > { %p468_p9 = pneg %p467_p7 }
  0x2e   : > { %p474_p0 = por %p473_p13, %p472_p12 }
  0x30   : > { %p475_p1 = pnand %p474_p0, %p468_p9 }
  0x32   : > { %478 = shalt.err (!%p475_p1)
}
  0x33   : > { %s532_s9 = smov 128   ;;  %s533_s10 = smov 8  }
  0x34   : > { %394 = dma.vmem_to_hbm [thread:$0]  (%p594_p4), %s627_s11, 1024, %s632_s21, %s652_s23, %s532_s9, %s532_s9, %s533_s10  }
  0x35 PF: > { %p400_p2 = scmp.ge.s32.totalorder %s529_s17, 2  ;;  %s294_s18 = sand.u32 1, %s509_s12  }
  0x36   : > { %s295_s15 = scalar_lea.sflag [#allocation3], %s294_s18 }
  0x37   : > { %p397_p3 = pnand %p400_p2, %p601_p8 }
  0x39   : > { %504 = dma.done.wait (!%p397_p3), %s295_s15, 1024  }
  0x3a   : > { %506 = vsyncadd (!%p397_p3), %s295_s15, 4294966272  ;;  %s16_s17 = sadd.s32 1, %s529_s17   ;;  %s704_s12 = smov %s513_s13 }
  0x3b   : > { %p13_p5 = scmp.ge.s32.totalorder %s16_s17, 4   ;;  %s705_s13 = smov %s517_s14 }
  0x3c   : > { %s706_s14 = smov %s607_s25  ;;  %s707_s15 = smov %s525_s16 }
  0x3d   : > { %s708_s16 = smov %s710_s20  ;;  %15 = sbr.rel (!%p13_p5) target bundleno = 4 (0x4), region = 67 }
  0x44   :  { %300 = vsyncpa [#allocation3], 1 }
  0x45   :  { %302 = vsyncpa [#allocation3 + $0x1], 1 }

// kernel: down_block.4
= control target key start
LH: loop header
LB: loop body
LE: loop exit
PB: predicated region body
PF: predicated region fallthrough
CT: control target
= control target key end

     0   :  { %s1599_s24 = smov 0   ;;  %s1601_s25 = smov 0   ;;  %s2039_s0 = inlined_call_operand.vmem [shape: bf16[2,8,8,8], index: 0, kind: input, shape index: {}, may-alias: {0,1,2}]   ;;  %s2040_s1 = inlined_call_operand.vmem [shape: bf16[2,8,8,8], index: 1, kind: input, shape index: {}, may-alias: {0,1,2}]   ;;  %s2041_s2 = inlined_call_operand.vmem [shape: bf16[2,8,8,8], index: 2, kind: input, shape index: {}, may-alias: {0,1,2}]   ;;  %s2042_s3 = inlined_call_operand.vmem [shape: f32[1,8], index: 3, kind: input, shape index: {}]   ;;  %s2043_s4 = inlined_call_operand.vmem [shape: f32[1,8], index: 4, kind: input, shape index: {}]   ;;  %s2044_s5 = inlined_call_operand.vmem [shape: bf16[72,8], index: 5, kind: input, shape index: {}]   ;;  %s2045_s6 = inlined_call_operand.vmem [shape: bf16[2,8,8,8], index: 6, kind: output, shape index: {0}]   ;;  %s2046_s7 = inlined_call_operand.vmem [shape: f32[2,1,2,8], index: 7, kind: output, shape index: {1}]  }
   0x1   :  { %s1603_s26 = smov 0  }
   0x2 LB: > { %s30_s27 = sadd.s32 1, %s1545_s25  ;;  %p1397_p0 = scmp.ge.s32.totalorder %s1549_s26, 1  ;;  %s1549_s26 = sphi %s1603_s26, %s18_s26   ;;  %s1545_s25 = sphi %s1601_s25, %s2052_s25   ;;  %s1541_s24 = sphi %s1599_s24, %s2051_s24  }
   0x3   : > { %p32_p1 = scmp.ge.s32.totalorder %s30_s27, 2  ;;  %p325_p2 = scmp.lt.s32.totalorder %s1549_s26, 3 }
   0x5   : > { %s2054_s27 = smov (%p32_p1, %s30_s27), 0  ;;  %p326_p3 = pnand %p1397_p0, %p325_p2 }
   0x6   : > { %p397_p4 = scmp.lt.s32.totalorder (!%p326_p3), %s1541_s24, 1  ;;  %v1633_v1 = vld [vmem:[%s2042_s3] ss:$0 sm:$0xff] (!%p326_p3)  ;;  %vm649_vm0 = vcmask (!%p326_p3), 1040384   ;;  %vm650_vm1 = vsmask.f32 (!%p326_p3), 256 }
   0x7   : > { %329 = sbr.rel (%p326_p3) target bundleno = 516 (0x204), region = 44  ;;  %v1642_v8 = vld [vmem:[%s2043_s4] ss:$0 sm:$0xff] (!%p326_p3)  ;;  %vm662_vm2 = vcmask (!%p326_p3), 1044480   ;;  %vm663_vm3 = vsmask.f32 (!%p326_p3), 4352  ;;  %vm1656_vm4 = vmand (!%p326_p3), %vm649_vm0, %vm650_vm1 }
   0x8   : > { %vm1662_vm5 = vmand (!%p326_p3), %vm662_vm2, %vm663_vm3  ;;  %s1551_s17 = smov (!%p326_p3), 24   ;;  %s1552_s22 = smov (!%p326_p3), 16   ;;  %vm1089_vm6 = vcmask (!%p326_p3), 1043456   ;;  %vm893_vm7 = vcmask (!%p326_p3), 64512   ;;  %vm910_vm8 = vcmask (!%p326_p3), 130048   ;;  %vm927_vm9 = vcmask (!%p326_p3), 195584  }
   0x9   : > { %s1553_s23 = smov (!%p326_p3), 8   ;;  %s1554_s29 = smov (!%p326_p3), 32   ;;  %vm944_vm10 = vcmask (!%p326_p3), 261120   ;;  %vm961_vm11 = vcmask (!%p326_p3), 326656   ;;  %vm978_vm12 = vcmask (!%p326_p3), 392192   ;;  %vm995_vm13 = vcmask (!%p326_p3), 457728  }
   0xa   : > { %s1555_s30 = smov (!%p326_p3), 40   ;;  %s1557_s20 = smov (!%p326_p3), 56   ;;  %vm1012_vm14 = vcmask (!%p326_p3), 523264   ;;  %vm1076_vm15 = vcmask (!%p326_p3), 588800   ;;  %vm1166_vm1 = vcmask (!%p326_p3), 60416   ;;  %vm1227_vm2 = vcmask (!%p326_p3), 58368  }
   0xe   : > { %s2056_s24 = smov (!%p397_p4, %s1541_s24), 1 }
   0xf   : > { %s1620_s28 = sshll.u32 %s2056_s24, 5 }
  0x10   : > { %s1626_s8 = scalar_lea.vmem %s2039_s0, %s1620_s28  ;;  %s1426_s9 = sadd.s32 4, %s1620_s28 }
  0x11   : > { %v1431_v0 = vld [vmem:[%s1626_s8] sm:$0xff]   ;;  %v1448_v2 = vld [vmem:[%s1626_s8 + $0x8] sm:$0xff]   ;;  %s417_s14 = scalar_lea.vmem %s2040_s1, %s1426_s9  ;;  %v1687_v61 = vld [vmem:[%s1626_s8 + $0x10] sm:$0xff]   ;;  %s1428_s18 = sadd.s32 24, %s1620_s28 }
  0x12   : > { %v1433_v3 = vunpack.c.h.bf16 %v1431_v0  ;;  %v1432_v4 = vunpack.c.l.bf16 %v1431_v0  ;;  %v1437_v5 = vunpack.c.h.bf16 %v1448_v2  ;;  %v1436_v6 = vunpack.c.l.bf16 %v1448_v2  ;;  %v456_v7 = vld [vmem:[%s417_s14] sm:$0xf]  ;;  %s433_s21 = scalar_lea.vmem %s2041_s2, %s1428_s18  ;;  %s1556_s14 = smov 48  }
  0x13   : > { %v466_v9 = vunpack.c.l.bf16 %v456_v7 }
  0x14   : > { %v485_v10 = vmul.f32 %v1433_v3, %v1633_v1  ;;  %v484_v11 = vmul.f32 %v1432_v4, %v1633_v1  ;;  %v487_v12 = vmul.f32 %v1437_v5, %v1633_v1  ;;  %v486_v13 = vmul.f32 %v1436_v6, %v1633_v1 }
  0x15   : > { %v483_v14 = vmul.f32 %v1633_v1, %v466_v9  ;;  %v1440_v4 = vunpack.c.l.bf16 %v1687_v61 }
  0x16   : > { %v502_v15 = vadd.f32 %v1642_v8, %v485_v10  ;;  %v501_v16 = vadd.f32 %v1642_v8, %v484_v11  ;;  %v504_v17 = vadd.f32 %v1642_v8, %v487_v12  ;;  %v503_v18 = vadd.f32 %v1642_v8, %v486_v13  ;;  %v465_v11 = vld [vmem:[%s433_s21] sm:$0xf]  ;;  %s1558_s21 = smov 64  }
  0x17   : > { %v500_v19 = vadd.f32 %v1642_v8, %v483_v14 }
  0x18   : > { %v512_v20 = vmax.f32 %v502_v15, 0.0  ;;  %v511_v21 = vmax.f32 %v501_v16, 0.0  ;;  %v514_v22 = vmax.f32 %v504_v17, 0.0  ;;  %v513_v23 = vmax.f32 %v503_v18, 0.0 }
  0x19   : > { %v510_v24 = vmax.f32 %v500_v19, 0.0  ;;  %v488_v15 = vmul.f32 %v1440_v4, %v1633_v1 }
  0x1a   : > { %v522_v25 = vpack.c.bf16 %v512_v20, %v512_v20  ;;  %v521_v26 = vpack.c.bf16 %v511_v21, %v511_v21  ;;  %v524_v27 = vpack.c.bf16 %v514_v22, %v514_v22  ;;  %v523_v28 = vpack.c.bf16 %v513_v23, %v513_v23  ;;  %v1450_v20 = vld [vmem:[%s1626_s8 + $0x18] sm:$0xff]  }
  0x1b   : > { %v520_v29 = vpack.c.bf16 %v510_v24, %v510_v24  ;;  %v1445_v21 = vunpack.c.h.bf16 %v1450_v20  ;;  %v475_v22 = vunpack.c.l.bf16 %v465_v11  ;;  %v505_v23 = vadd.f32 %v1642_v8, %v488_v15 }
  0x1c   : > { %v546_v30 = vshrl.u32 %v522_v25, 16  ;;  %v588_v31 = vshll.u32 %v522_v25, 16  ;;  %v543_v32 = vshrl.u32 %v521_v26, 16  ;;  %v584_v33 = vshll.u32 %v521_v26, 16 }
  0x1d   : > { %v552_v34 = vshrl.u32 %v524_v27, 16  ;;  %v596_v35 = vshll.u32 %v524_v27, 16  ;;  %v549_v36 = vshrl.u32 %v523_v28, 16  ;;  %v592_v37 = vshll.u32 %v523_v28, 16 }
  0x1e   : > { %v587_v38 = vrot.slane %v546_v30, 7  ;;  %v583_v39 = vrot.slane %v543_v32, 7  ;;  %v631_v40 = vrot.slane %v588_v31, 7  ;;  %v630_v42 = vrot.slane %v584_v33, 7 }
  0x1f   : > { %v595_v43 = vrot.slane %v552_v34, 7  ;;  %v591_v44 = vrot.slane %v549_v36, 7  ;;  %v633_v48 = vrot.slane %v596_v35, 7  ;;  %v540_v49 = vshrl.u32 %v520_v29, 16 }
  0x20   : > { %v590_v45 = vor.u32 %v588_v31, %v587_v38  ;;  %v586_v47 = vor.u32 %v584_v33, %v583_v39  ;;  %v632_v52 = vrot.slane %v592_v37, 7  ;;  %v580_v53 = vshll.u32 %v520_v29, 16 }
  0x21   : > { %v598_v50 = vor.u32 %v596_v35, %v595_v43  ;;  %v594_v51 = vor.u32 %v592_v37, %v591_v44  ;;  %v579_v56 = vrot.slane %v540_v49, 7  ;;  %v491_v24 = vmul.f32 %v1445_v21, %v1633_v1 }
  0x22   : > { %v654_v54 = vsel %vm1656_vm4, %v546_v30, %v590_v45  ;;  %v653_v55 = vsel %vm1656_vm4, %v543_v32, %v586_v47  ;;  %v629_v2 = vrot.slane %v580_v53, 7  ;;  %v492_v25 = vmul.f32 %v1633_v1, %v475_v22 }
  0x23   : > { %v1672_v57 = vsel %vm1662_vm5, %v654_v54, %v631_v40  ;;  %v1676_v58 = vsel %vm1662_vm5, %v653_v55, %v630_v42  ;;  %v656_v59 = vsel %vm1656_vm4, %v552_v34, %v598_v50  ;;  %v655_v60 = vsel %vm1656_vm4, %v549_v36, %v594_v51 }
  0x24   : > { %782 = vrot.lane.b32.xlu1 %v1672_v57, %s1551_s17  ;;  %780 = vrot.lane.b32.xlu0 %v1676_v58, %s1551_s17  ;;  %v1692_v62 = vsel %vm1662_vm5, %v656_v59, %v633_v48  ;;  %v1696_v63 = vsel %vm1662_vm5, %v655_v60, %v632_v52  ;;  %v582_v0 = vor.u32 %v580_v53, %v579_v56  ;;  %v1709_v5 = vrot.slane %v1672_v57, 1 }
  0x25   : > { %v756_v6 = vrot.slane %v1676_v58, 1  ;;  %v692_v7 = vshll.u32 %v1672_v57, 16  ;;  %v685_v9 = vshll.u32 %v1676_v58, 16  ;;  %v1719_v12 = vrot.slane %v1696_v63, 1 }
  0x26   : > { %v652_v3 = vsel %vm1656_vm4, %v540_v49, %v582_v0  ;;  %v690_v13 = vshrl.u32 %v1672_v57, 16  ;;  %v683_v14 = vshrl.u32 %v1676_v58, 16  ;;  %v699_v19 = vshll.u32 %v1696_v63, 16 }
  0x27   : > { %v1716_v10 = vsel %vm1662_vm5, %v652_v3, %v629_v2  ;;  %v694_v17 = vrot.slane %v692_v7, 1  ;;  %v687_v18 = vrot.slane %v685_v9, 1  ;;  %v697_v28 = vshrl.u32 %v1696_v63, 16 }
  0x28   : > { %786 = vrot.lane.b32.xlu1 %v1692_v62, %s1551_s17  ;;  %784 = vrot.lane.b32.xlu0 %v1696_v63, %s1551_s17  ;;  %v755_v16 = vrot.slane %v1716_v10, 1  ;;  %v701_v29 = vrot.slane %v699_v19, 1  ;;  %v508_v30 = vadd.f32 %v1642_v8, %v491_v24  ;;  %v509_v31 = vadd.f32 %v1642_v8, %v492_v25 }
  0x29   : > { %v1738_v26 = vor.u32 %v694_v17, %v690_v13  ;;  %v688_v27 = vor.u32 %v687_v18, %v683_v14  ;;  %v515_v32 = vmax.f32 %v505_v23, 0.0  ;;  %v706_v34 = vshll.u32 %v1692_v62, 16  ;;  %v1522_v18 = vld [vmem:[%s2044_s5] sm:$0xff]   ;;  %v1523_v23 = vld [vmem:[%s2044_s5 + $0x8] sm:$0xff]  }
  0x2a   : > { %v1746_v33 = vor.u32 %v701_v29, %v697_v28  ;;  %v518_v35 = vmax.f32 %v508_v30, 0.0  ;;  %v519_v36 = vmax.f32 %v509_v31, 0.0  ;;  %v1441_v37 = vunpack.c.h.bf16 %v1687_v61  ;;  %1460 = vmatprep.subr.bf16.mxu0 %v1522_v18  ;;  %1478 = vmatprep.subr.bf16.mxu1 %v1522_v18  ;;  %v1524_v29 = vld [vmem:[%s2044_s5 + $0x10] sm:$0xff]  }
  0x2b   : > { %v1444_v38 = vunpack.c.l.bf16 %v1450_v20  ;;  %v525_v39 = vpack.c.bf16 %v515_v32, %v515_v32  ;;  %v704_v43 = vshrl.u32 %v1692_v62, 16  ;;  %v708_v44 = vrot.slane %v706_v34, 1  ;;  %1461 = vmatpush3.bf16.msra.mxu0 %v1522_v18  ;;  %1483 = vmatpush3.bf16.msra.mxu1 %v1522_v18 }
  0x2c   : > { %767 = vrot.lane.b32.xlu0 %v1709_v5, %s1552_s22  ;;  %765 = vrot.lane.b32.xlu1 %v756_v6, %s1552_s22  ;;  %v528_v40 = vpack.c.bf16 %v518_v35, %v518_v35  ;;  %v529_v42 = vpack.c.bf16 %v519_v36, %v519_v36  ;;  %v678_v45 = vshll.u32 %v1716_v10, 16  ;;  %v489_v51 = vmul.f32 %v1441_v37, %v1633_v1  ;;  %v1525_v36 = vld [vmem:[%s2044_s5 + $0x18] sm:$0xff]  }
  0x2d   : > { %v490_v52 = vmul.f32 %v1444_v38, %v1633_v1  ;;  %v676_v53 = vshrl.u32 %v1716_v10, 16  ;;  %v555_v54 = vshrl.u32 %v525_v39, 16  ;;  %v1762_v59 = vor.u32 %v708_v44, %v704_v43  ;;  %1462 = vmatprep.subr.bf16.mxu0 %v1523_v23  ;;  %1479 = vmatprep.subr.bf16.mxu1 %v1523_v23 }
  0x2e   : > { %v564_v47 = vshrl.u32 %v528_v40, 16  ;;  %v612_v48 = vshll.u32 %v528_v40, 16  ;;  %v567_v49 = vshrl.u32 %v529_v42, 16  ;;  %v616_v50 = vshll.u32 %v529_v42, 16  ;;  %v1526_v42 = vld [vmem:[%s2044_s5 + $0x20] ss:$0 sps:$4 sm:$0xff]  }
  0x2f   : > { %v680_v60 = vrot.slane %v678_v45, 1  ;;  %v507_v1 = vadd.f32 %v1642_v8, %v490_v52  ;;  %v506_v4 = vadd.f32 %v1642_v8, %v489_v51  ;;  %v600_v7 = vshll.u32 %v525_v39, 16  ;;  %1463 = vmatpush3.bf16.msra.mxu0 %v1523_v23  ;;  %1484 = vmatpush3.bf16.msra.mxu1 %v1523_v23 }
  0x30   : > { %763 = vrot.lane.b32.xlu0 %v755_v16, %s1552_s22  ;;  %769 = vrot.lane.b32.xlu1 %v1719_v12, %s1552_s22  ;;  %v611_v55 = vrot.slane %v564_v47, 7  ;;  %v615_v56 = vrot.slane %v567_v49, 7  ;;  %v637_v61 = vrot.slane %v612_v48, 7  ;;  %v638_v0 = vrot.slane %v616_v50, 7 }
  0x31   : > { %v681_v13 = vor.u32 %v680_v60, %v676_v53  ;;  %v599_v14 = vrot.slane %v555_v54, 7  ;;  %v517_v16 = vmax.f32 %v507_v1, 0.0  ;;  %v516_v17 = vmax.f32 %v506_v4, 0.0  ;;  %1464 = vmatprep.subr.bf16.mxu0 %v1524_v29  ;;  %1480 = vmatprep.subr.bf16.mxu1 %v1524_v29 }
  0x32   : > { %v614_v2 = vor.u32 %v612_v48, %v611_v55  ;;  %v618_v3 = vor.u32 %v616_v50, %v615_v56  ;;  %v634_v22 = vrot.slane %v600_v7, 7 }
  0x33   : > { %v602_v19 = vor.u32 %v600_v7, %v599_v14  ;;  %v527_v20 = vpack.c.bf16 %v517_v16, %v517_v16  ;;  %v526_v21 = vpack.c.bf16 %v516_v17, %v516_v17  ;;  %1465 = vmatpush3.bf16.msra.mxu0 %v1524_v29  ;;  %1485 = vmatpush3.bf16.msra.mxu1 %v1524_v29 }
  0x34   : > { %735 = vrot.lane.b32.xlu1 %v1738_v26, %s1553_s23  ;;  %733 = vrot.lane.b32.xlu0 %v688_v27, %s1553_s23  ;;  %v660_v9 = vsel %vm1656_vm4, %v564_v47, %v614_v2  ;;  %v661_v11 = vsel %vm1656_vm4, %v567_v49, %v618_v3  ;;  %v1091_v49 = vsel %vm1089_vm6, %v1526_v42, 0 }
  0x35   : > { %v1777_v8 = vsel %vm1662_vm5, %v660_v9, %v637_v61  ;;  %v1781_v15 = vsel %vm1662_vm5, %v661_v11, %v638_v0  ;;  %v657_v24 = vsel %vm1656_vm4, %v555_v54, %v602_v19  ;;  %v561_v25 = vshrl.u32 %v527_v20, 16  ;;  %1466 = vmatprep.subr.bf16.mxu0 %v1525_v36  ;;  %1481 = vmatprep.subr.bf16.mxu1 %v1525_v36 }
  0x36   : > { %v1803_v28 = vsel %vm1662_vm5, %v657_v24, %v634_v22  ;;  %v608_v32 = vshll.u32 %v527_v20, 16  ;;  %v604_v35 = vshll.u32 %v526_v21, 16  ;;  %v797_v60 = vshrl.u32 %v1777_v8, 16 }
  0x37   : > { %v713_v30 = vshll.u32 %v1803_v28, 16  ;;  %v607_v31 = vrot.slane %v561_v25, 7  ;;  %v711_v37 = vshrl.u32 %v1803_v28, 16  ;;  %1467 = vmatpush3.bf16.msra.mxu0 %v1525_v36  ;;  %1486 = vmatpush3.bf16.msra.mxu1 %v1525_v36  ;;  %v760_v51 = vrot.slane %v1803_v28, 1 }
  0x38   : > { %737 = vrot.lane.b32.xlu1 %v1746_v33, %s1553_s23  ;;  %803 = vrot.lane.b32.xlu0 %v688_v27, %s1554_s29  ;;  %v558_v27 = vshrl.u32 %v526_v21, 16  ;;  %v636_v44 = vrot.slane %v608_v32, 7  ;;  %v635_v45 = vrot.slane %v604_v35, 7  ;;  %v819_v2 = vrot.slane %v1777_v8, 1 }
  0x39   : > { %v715_v38 = vrot.slane %v713_v30, 1  ;;  %v610_v39 = vor.u32 %v608_v32, %v607_v31  ;;  %1488 = vmatprep.subr.msk.bf16.mxu0 %vm1089_vm6, %v1526_v42  ;;  %1489 = vmatprep.subr.msk.bf16.mxu1 %vm1089_vm6, %v1526_v42  ;;  %v856_v3 = vshll.u32 %v1781_v15, 16  ;;  %v854_v1 = vshrl.u32 %v1781_v15, 16 }
  0x3a   : > { %v603_v34 = vrot.slane %v558_v27, 7 }
  0x3b   : > { %v716_v43 = vor.u32 %v715_v38, %v711_v37  ;;  %v659_v47 = vsel %vm1656_vm4, %v561_v25, %v610_v39  ;;  %1469 = vmatpush3.bf16.msra.mxu0 %v1091_v49  ;;  %1487 = vmatpush3.bf16.msra.mxu1 %v1091_v49  ;;  %v858_v4 = vrot.slane %v856_v3, 1 }
  0x3c   : > { %805 = vrot.lane.b32.xlu1 %v1738_v26, %s1554_s29  ;;  %807 = vrot.lane.b32.xlu0 %v1746_v33, %s1554_s29  ;;  %v606_v40 = vor.u32 %v604_v35, %v603_v34 }
  0x3d   : > { %v859_v7 = vor.u32 %v858_v4, %v854_v1 }
  0x3e   : > { %v658_v48 = vsel %vm1656_vm4, %v558_v27, %v606_v40 }
  0x40   : > { %809 = vrot.lane.b32.xlu1 %v1762_v59, %s1554_s29  ;;  %820 = vrot.lane.b32.xlu0 %v756_v6, %s1555_s30  ;;  %v1790_v6 = vrot.slane %v1692_v62, 1 }
  0x44   : > { %822 = vrot.lane.b32.xlu1 %v1709_v5, %s1555_s30  ;;  %731 = vrot.lane.b32.xlu0 %v681_v13, %s1553_s23 }
  0x48   : > { %826 = vrot.lane.b32.xlu1 %v1790_v6, %s1555_s30  ;;  %824 = vrot.lane.b32.xlu0 %v1719_v12, %s1555_s30 }
  0x4c   : > { %839 = vrot.lane.b32.xlu1 %v1696_v63, %s1556_s14  ;;  %837 = vrot.lane.b32.xlu0 %v1672_v57, %s1556_s14 }
  0x50   : > { %843 = vrot.lane.b32.xlu1 %v1803_v28, %s1556_s14  ;;  %841 = vrot.lane.b32.xlu0 %v1692_v62, %s1556_s14 }
  0x54   : > { %862 = vrot.lane.b32.xlu1 %v1746_v33, %s1557_s20  ;;  %860 = vrot.lane.b32.xlu0 %v1738_v26, %s1557_s20  ;;  %v1837_v26 = vsel %vm1662_vm5, %v659_v47, %v636_v44  ;;  %v1841_v33 = vsel %vm1662_vm5, %v658_v48, %v635_v45 }
  0x55   : > { %v727_v41 = vshll.u32 %v1837_v26, 16  ;;  %v720_v50 = vshll.u32 %v1841_v33, 16  ;;  %v725_v46 = vshrl.u32 %v1837_v26, 16  ;;  %v718_v53 = vshrl.u32 %v1841_v33, 16 }
  0x56   : > { %v762_v55 = vrot.slane %v1837_v26, 1  ;;  %v761_v56 = vrot.slane %v1841_v33, 1 }
  0x57   : > { %v729_v52 = vrot.slane %v727_v41, 1 }
  0x58   : > { %866 = vrot.lane.b32.xlu1 %v716_v43, %s1557_s20  ;;  %864 = vrot.lane.b32.xlu0 %v1762_v59, %s1557_s20 }
  0x5c   : > { %879 = vrot.lane.b32.xlu1 %v1719_v12, %s1558_s21  ;;  %877 = vrot.lane.b32.xlu0 %v1709_v5, %s1558_s21  ;;  %v722_v12 = vrot.slane %v720_v50, 1  ;;  %v730_v5 = vor.u32 %v729_v52, %v725_v46 }
  0x5e   : > { %v723_v54 = vor.u32 %v722_v12, %v718_v53 }
  0x60   : > { %741 = vrot.lane.b32.xlu1 %v716_v43, %s1553_s23  ;;  %739 = vrot.lane.b32.xlu0 %v1762_v59, %s1553_s23  ;;  %v799_v59 = vshll.u32 %v1777_v8, 16 }
  0x62   : > { %v801_v61 = vrot.slane %v799_v59, 1 }
  0x64   : > { %883 = vrot.lane.b32.xlu1 %v760_v51, %s1558_s21  ;;  %881 = vrot.lane.b32.xlu0 %v1790_v6, %s1558_s21  ;;  %v802_v0 = vor.u32 %v801_v61, %v797_v60 }
  0x68   : > { %745 = vrot.lane.b32.xlu1 %v730_v5, %s1553_s23  ;;  %743 = vrot.lane.b32.xlu0 %v723_v54, %s1553_s23  ;;  %s1991_s23 = scalar_lea.vmem %s2045_s6, %s1620_s28  ;;  %s1406_s28 = sshll.u32 %s2056_s24, 1 }
  0x69   : > { %s454_s8 = scalar_lea.vmem %s2046_s7, %s1406_s28 }
  0x6c   : > { %773 = vrot.lane.b32.xlu1 %v760_v51, %s1552_s22  ;;  %771 = vrot.lane.b32.xlu0 %v1790_v6, %s1552_s22 }
  0x70   : > { %777 = vrot.lane.b32.xlu1 %v762_v55, %s1552_s22  ;;  %775 = vrot.lane.b32.xlu0 %v761_v56, %s1552_s22 }
  0x74   : > { %790 = vrot.lane.b32.xlu1 %v1841_v33, %s1551_s17  ;;  %788 = vrot.lane.b32.xlu0 %v1803_v28, %s1551_s17 }
  0x78   : > { %794 = vrot.lane.b32.xlu1 %v1777_v8, %s1551_s17  ;;  %792 = vrot.lane.b32.xlu0 %v1837_v26, %s1551_s17 }
  0x7c   : > { %813 = vrot.lane.b32.xlu1 %v723_v54, %s1554_s29  ;;  %811 = vrot.lane.b32.xlu0 %v716_v43, %s1554_s29 }
  0x80   : > { %817 = vrot.lane.b32.xlu1 %v802_v0, %s1554_s29  ;;  %815 = vrot.lane.b32.xlu0 %v730_v5, %s1554_s29 }
  0x84   : > { %830 = vrot.lane.b32.xlu1 %v761_v56, %s1555_s30  ;;  %828 = vrot.lane.b32.xlu0 %v760_v51, %s1555_s30 }
  0x88   : > { %834 = vrot.lane.b32.xlu1 %v819_v2, %s1555_s30  ;;  %832 = vrot.lane.b32.xlu0 %v762_v55, %s1555_s30 }
  0x8c   : > { %847 = vrot.lane.b32.xlu1 %v1837_v26, %s1556_s14  ;;  %845 = vrot.lane.b32.xlu0 %v1841_v33, %s1556_s14 }
  0x90   : > { %851 = vrot.lane.b32.xlu1 %v1781_v15, %s1556_s14  ;;  %849 = vrot.lane.b32.xlu0 %v1777_v8, %s1556_s14  ;;  %v876_v8 = vrot.slane %v1781_v15, 1 }
  0x94   : > { %870 = vrot.lane.b32.xlu1 %v730_v5, %s1557_s20  ;;  %868 = vrot.lane.b32.xlu0 %v723_v54, %s1557_s20 }
  0x96   : > { %v783_v9 = vpop.permute.xlu1 %782  ;;  %v781_v11 = vpop.permute.xlu0 %780 }
  0x98   : > { %874 = vrot.lane.b32.xlu1 %v859_v7, %s1557_s20  ;;  %872 = vrot.lane.b32.xlu0 %v802_v0, %s1557_s20 }
  0x9a   : > { %v1900_v13 = vpop.permute.xlu1 %786  ;;  %v1902_v14 = vpop.permute.xlu0 %784 }
  0x9c   : > { %887 = vrot.lane.b32.xlu1 %v762_v55, %s1558_s21  ;;  %885 = vrot.lane.b32.xlu0 %v761_v56, %s1558_s21 }
  0x9e   : > { %v768_v16 = vpop.permute.xlu0 %767  ;;  %v766_v17 = vpop.permute.xlu1 %765 }
  0xa0   : > { %891 = vrot.lane.b32.xlu1 %v876_v8, %s1558_s21  ;;  %889 = vrot.lane.b32.xlu0 %v819_v2, %s1558_s21 }
  0xa2   : > { %v764_v18 = vpop.permute.xlu0 %763  ;;  %v770_v6 = vpop.permute.xlu1 %769 }
  0xa6   : > { %v736_v19 = vpop.permute.xlu1 %735  ;;  %v734_v20 = vpop.permute.xlu0 %733 }
  0xa7   : > { %v897_v39 = vsel %vm893_vm7, %v1676_v58, %v734_v20  ;;  %v899_v58 = vsel %vm893_vm7, %v1672_v57, %v736_v19 }
  0xa8   : > { %v914_v44 = vsel %vm910_vm8, %v897_v39, %v766_v17  ;;  %v916_v57 = vsel %vm910_vm8, %v899_v58, %v768_v16 }
  0xa9   : > { %v933_v60 = vsel %vm927_vm9, %v916_v57, %v1902_v14 }
  0xaa   : > { %v738_v21 = vpop.permute.xlu1 %737  ;;  %v804_v22 = vpop.permute.xlu0 %803 }
  0xab   : > { %v901_v41 = vsel %vm893_vm7, %v1696_v63, %v738_v21 }
  0xac   : > { %v918_v55 = vsel %vm910_vm8, %v901_v41, %v770_v6 }
  0xad   : > { %v935_v61 = vsel %vm927_vm9, %v918_v55, %v1900_v13 }
  0xae   : > { %v806_v23 = vpop.permute.xlu1 %805  ;;  %v808_v24 = vpop.permute.xlu0 %807 }
  0xaf   : > { %v950_v3 = vsel %vm944_vm10, %v933_v60, %v808_v24 }
  0xb2   : > { %v810_v25 = vpop.permute.xlu1 %809  ;;  %v821_v27 = vpop.permute.xlu0 %820 }
  0xb3   : > { %v952_v1 = vsel %vm944_vm10, %v935_v61, %v810_v25 }
  0xb6   : > { %v823_v29 = vpop.permute.xlu1 %822  ;;  %v732_v30 = vpop.permute.xlu0 %731 }
  0xb7   : > { %v895_v35 = vsel %vm893_vm7, %v1716_v10, %v732_v30  ;;  %v931_v10 = vsel %vm927_vm9, %v914_v44, %v783_v9 }
  0xb8   : > { %v912_v38 = vsel %vm910_vm8, %v895_v35, %v764_v18  ;;  %v948_v49 = vsel %vm944_vm10, %v931_v10, %v806_v23 }
  0xb9   : > { %v929_v40 = vsel %vm927_vm9, %v912_v38, %v781_v11  ;;  %v965_v50 = vsel %vm961_vm11, %v948_v49, %v823_v29 }
  0xba   : > { %v827_v31 = vpop.permute.xlu1 %826  ;;  %v825_v15 = vpop.permute.xlu0 %824  ;;  %v946_v45 = vsel %vm944_vm10, %v929_v40, %v804_v22 }
  0xbb   : > { %v963_v51 = vsel %vm961_vm11, %v946_v45, %v821_v27  ;;  %v969_v4 = vsel %vm961_vm11, %v952_v1, %v827_v31  ;;  %v967_v7 = vsel %vm961_vm11, %v950_v3, %v825_v15 }
  0xbe   : > { %v840_v32 = vpop.permute.xlu1 %839  ;;  %v838_v34 = vpop.permute.xlu0 %837 }
  0xbf   : > { %v982_v46 = vsel %vm978_vm12, %v965_v50, %v840_v32  ;;  %v980_v52 = vsel %vm978_vm12, %v963_v51, %v838_v34 }
  0xc2   : > { %v844_v36 = vpop.permute.xlu1 %843  ;;  %v842_v37 = vpop.permute.xlu0 %841 }
  0xc3   : > { %v986_v9 = vsel %vm978_vm12, %v969_v4, %v844_v36  ;;  %v984_v11 = vsel %vm978_vm12, %v967_v7, %v842_v37 }
  0xc6   : > { %v863_v42 = vpop.permute.xlu1 %862  ;;  %v861_v43 = vpop.permute.xlu0 %860 }
  0xc7   : > { %v999_v53 = vsel %vm995_vm13, %v982_v46, %v863_v42  ;;  %v997_v12 = vsel %vm995_vm13, %v980_v52, %v861_v43 }
  0xca   : > { %v867_v47 = vpop.permute.xlu1 %866  ;;  %v865_v48 = vpop.permute.xlu0 %864 }
  0xcb   : > { %v1003_v14 = vsel %vm995_vm13, %v986_v9, %v867_v47  ;;  %v1001_v13 = vsel %vm995_vm13, %v984_v11, %v865_v48 }
  0xce   : > { %v880_v5 = vpop.permute.xlu1 %879  ;;  %v878_v54 = vpop.permute.xlu0 %877 }
  0xcf   : > { %v1016_v63 = vsel %vm1012_vm14, %v999_v53, %v880_v5  ;;  %v1014_v56 = vsel %vm1012_vm14, %v997_v12, %v878_v54 }
  0xd0   : > { %v1409_v59 = vcombine.low %v1014_v56, %v1016_v63 }
  0xd2   : > { %v742_v0 = vpop.permute.xlu1 %741  ;;  %1470 = vmatprep.mubr.msk.bf16.mxu0 %vm1076_vm15, %v1409_v59  ;;  %v740_v2 = vpop.permute.xlu0 %739 }
  0xd3   : > { %v905_v10 = vsel %vm893_vm7, %v1803_v28, %v742_v0  ;;  %v903_v47 = vsel %vm893_vm7, %v1692_v62, %v740_v2 }
  0xd6   : > { %v884_v8 = vpop.permute.xlu1 %883  ;;  %v882_v16 = vpop.permute.xlu0 %881 }
  0xd7   : > { %v1020_v17 = vsel %vm1012_vm14, %v1003_v14, %v884_v8  ;;  %v1018_v18 = vsel %vm1012_vm14, %v1001_v13, %v882_v16 }
  0xd8   : > { %v1410_v6 = vcombine.low %v1018_v18, %v1020_v17 }
  0xda   : > { %v746_v19 = vpop.permute.xlu1 %745  ;;  %1471 = vmatmul.mubr.msk.bf16.vlgmr.msra.gmra.mrb[0].mxu0 %vm1076_vm15, %v1410_v6  ;;  %v744_v20 = vpop.permute.xlu0 %743 }
  0xdb   : > { %v909_v28 = vsel %vm893_vm7, %v1837_v26, %v746_v19  ;;  %v907_v62 = vsel %vm893_vm7, %v1841_v33, %v744_v20 }
  0xde   : > { %v774_v21 = vpop.permute.xlu1 %773  ;;  %v772_v22 = vpop.permute.xlu0 %771 }
  0xdf   : > { %v922_v48 = vsel %vm910_vm8, %v905_v10, %v774_v21  ;;  %v920_v49 = vsel %vm910_vm8, %v903_v47, %v772_v22 }
  0xe2   : > { %v778_v23 = vpop.permute.xlu1 %777  ;;  %v776_v24 = vpop.permute.xlu0 %775 }
  0xe3   : > { %v926_v5 = vsel %vm910_vm8, %v909_v28, %v778_v23  ;;  %v924_v54 = vsel %vm910_vm8, %v907_v62, %v776_v24 }
  0xe6   : > { %v791_v25 = vpop.permute.xlu1 %790  ;;  %v789_v27 = vpop.permute.xlu0 %788 }
  0xe7   : > { %v939_v58 = vsel %vm927_vm9, %v922_v48, %v791_v25  ;;  %v937_v41 = vsel %vm927_vm9, %v920_v49, %v789_v27 }
  0xea   : > { %v795_v29 = vpop.permute.xlu1 %794  ;;  %v793_v30 = vpop.permute.xlu0 %792 }
  0xeb   : > { %v943_v63 = vsel %vm927_vm9, %v926_v5, %v795_v29  ;;  %v941_v56 = vsel %vm927_vm9, %v924_v54, %v793_v30 }
  0xee   : > { %v814_v31 = vpop.permute.xlu1 %813  ;;  %v812_v15 = vpop.permute.xlu0 %811 }
  0xef   : > { %v956_v46 = vsel %vm944_vm10, %v939_v58, %v814_v31  ;;  %v954_v52 = vsel %vm944_vm10, %v937_v41, %v812_v15 }
  0xf2   : > { %v818_v32 = vpop.permute.xlu1 %817  ;;  %v816_v34 = vpop.permute.xlu0 %815 }
  0xf3   : > { %v960_v61 = vsel %vm944_vm10, %v943_v63, %v818_v32  ;;  %v958_v0 = vsel %vm944_vm10, %v941_v56, %v816_v34 }
  0xf6   : > { %v831_v35 = vpop.permute.xlu1 %830  ;;  %v829_v36 = vpop.permute.xlu0 %828 }
  0xf7   : > { %v973_v53 = vsel %vm961_vm11, %v956_v46, %v831_v35  ;;  %v971_v12 = vsel %vm961_vm11, %v954_v52, %v829_v36 }
  0xfa   : > { %v835_v37 = vpop.permute.xlu1 %834  ;;  %v833_v38 = vpop.permute.xlu0 %832 }
  0xfb   : > { %v977_v1 = vsel %vm961_vm11, %v960_v61, %v835_v37  ;;  %v975_v4 = vsel %vm961_vm11, %v958_v0, %v833_v38 }
  0xfe   : > { %v848_v39 = vpop.permute.xlu1 %847  ;;  %v846_v40 = vpop.permute.xlu0 %845 }
  0xff   : > { %v990_v57 = vsel %vm978_vm12, %v973_v53, %v848_v39  ;;  %v988_v55 = vsel %vm978_vm12, %v971_v12, %v846_v40 }
 0x102   : > { %v852_v42 = vpop.permute.xlu1 %851  ;;  %v850_v43 = vpop.permute.xlu0 %849 }
 0x103   : > { %v994_v9 = vsel %vm978_vm12, %v977_v1, %v852_v42  ;;  %v992_v11 = vsel %vm978_vm12, %v975_v4, %v850_v43 }
 0x106   : > { %v871_v44 = vpop.permute.xlu1 %870  ;;  %v869_v45 = vpop.permute.xlu0 %868 }
 0x107   : > { %v1007_v26 = vsel %vm995_vm13, %v990_v57, %v871_v44  ;;  %v1005_v33 = vsel %vm995_vm13, %v988_v55, %v869_v45 }
 0x10a   : > { %v875_v50 = vpop.permute.xlu1 %874  ;;  %v873_v51 = vpop.permute.xlu0 %872 }
 0x10b   : > { %v1011_v14 = vsel %vm995_vm13, %v994_v9, %v875_v50  ;;  %v1009_v13 = vsel %vm995_vm13, %v992_v11, %v873_v51 }
 0x10e   : > { %v888_v59 = vpop.permute.xlu1 %887  ;;  %v886_v60 = vpop.permute.xlu0 %885 }
 0x10f   : > { %v1024_v2 = vsel %vm1012_vm14, %v1007_v26, %v888_v59  ;;  %v1022_v3 = vsel %vm1012_vm14, %v1005_v33, %v886_v60 }
 0x110   : > { %v1411_v7 = vcombine.low %v1022_v3, %v1024_v2 }
 0x112   : > { %v892_v8 = vpop.permute.xlu1 %891  ;;  %1474 = vmatprep.mubr.msk.bf16.mxu1 %vm1076_vm15, %v1411_v7  ;;  %v890_v16 = vpop.permute.xlu0 %889 }
 0x113   : > { %v1028_v17 = vsel %vm1012_vm14, %v1011_v14, %v892_v8  ;;  %v1026_v18 = vsel %vm1012_vm14, %v1009_v13, %v890_v16 }
 0x114   : > { %v1412_v6 = vcombine.low %v1026_v18, %v1028_v17 }
 0x116   : > { %1475 = vmatmul.mubr.msk.bf16.vlgmr.msra.gmra.mrb[0].mxu1 %vm1076_vm15, %v1412_v6 }
 0x1ad   : > { %v1472_v19 = vpop.f32.mrb[0].mxu0 }
 0x1ae   : > { %v1160_v20 = vpack.c.bf16 %v1472_v19, %v1472_v19  ;;  %v1127_v21 = vpop.f32.mrb[1].mxu0  ;;  %v1198_v25 = vmul.f32 %v1472_v19, %v1472_v19  ;;  %v1178_v35 = vsel %vm893_vm7, %v1472_v19, 0.0 }
 0x1af   : > { %v1158_v22 = vpack.c.bf16 %v1127_v21, %v1127_v21  ;;  %v1196_v23 = vmul.f32 %v1127_v21, %v1127_v21  ;;  %v1473_v24 = vpop.f32.mrb[2].mxu0  ;;  %v1175_v30 = vsel %vm893_vm7, %v1127_v21, 0.0 }
 0x1b0   : > { %1169 = vst.msk [vmem:[%s1991_s23 + $0x8] sm:$0xf] %vm1166_vm1, %v1160_v20  ;;  %v1161_v27 = vpack.c.bf16 %v1473_v24, %v1473_v24  ;;  %v1130_v29 = vpop.f32.mrb[3].mxu0  ;;  %v1199_v37 = vmul.f32 %v1473_v24, %v1473_v24  ;;  %v1207_v42 = vsel %vm893_vm7, %v1198_v25, 0.0  ;;  %v1180_v43 = vsel %vm893_vm7, %v1473_v24, 0.0 }
 0x1b1   : > { %1167 = vst.msk [vmem:[%s1991_s23] sm:$0xf] %vm1166_vm1, %v1158_v22  ;;  %v1159_v31 = vpack.c.bf16 %v1130_v29, %v1130_v29  ;;  %v1176_v15 = vsel %vm893_vm7, %v1130_v29, 0.0  ;;  %v1197_v32 = vmul.f32 %v1130_v29, %v1130_v29  ;;  %v1204_v36 = vsel %vm893_vm7, %v1196_v23, 0.0 }
 0x1b2   : > { %1170 = vst.msk [vmem:[%s1991_s23 + $0xc] sm:$0xf] %vm1166_vm1, %v1161_v27  ;;  %v1177_v34 = vadd.f32 %v1176_v15, %v1175_v30  ;;  %v1209_v10 = vsel %vm893_vm7, %v1199_v37, 0.0 }
 0x1b3   : > { %1168 = vst.msk [vmem:[%s1991_s23 + $0x4] sm:$0xf] %vm1166_vm1, %v1159_v31  ;;  %v1205_v38 = vsel %vm893_vm7, %v1197_v32, 0.0 }
 0x1b4   : > { %v1179_v39 = vadd.f32 %v1178_v35, %v1177_v34  ;;  %v1206_v40 = vadd.f32 %v1205_v38, %v1204_v36 }
 0x1b6   : > { %v1208_v44 = vadd.f32 %v1207_v42, %v1206_v40  ;;  %v1181_v45 = vadd.f32 %v1180_v43, %v1179_v39 }
 0x1b8   : > { %v1210_v47 = vadd.f32 %v1209_v10, %v1208_v44 }
 0x1e9   : > { %v1476_v48 = vpop.f32.mrb[0].mxu1 }
 0x1ea   : > { %v1164_v49 = vpack.c.bf16 %v1476_v48, %v1476_v48  ;;  %v1143_v58 = vpop.f32.mrb[1].mxu1  ;;  %v1202_v54 = vmul.f32 %v1476_v48, %v1476_v48  ;;  %v1186_v56 = vsel %vm893_vm7, %v1476_v48, 0.0 }
 0x1eb   : > { %v1162_v41 = vpack.c.bf16 %v1143_v58, %v1143_v58  ;;  %v1182_v50 = vsel %vm893_vm7, %v1143_v58, 0.0  ;;  %v1200_v51 = vmul.f32 %v1143_v58, %v1143_v58  ;;  %v1477_v46 = vpop.f32.mrb[2].mxu1 }
 0x1ec   : > { %1173 = vst.msk [vmem:[%s1991_s23 + $0x18] sm:$0xf] %vm1166_vm1, %v1164_v49  ;;  %v1183_v52 = vadd.f32 %v1182_v50, %v1181_v45  ;;  %v1165_v28 = vpack.c.bf16 %v1477_v46, %v1477_v46  ;;  %v1146_v62 = vpop.f32.mrb[3].mxu1  ;;  %v1203_v26 = vmul.f32 %v1477_v46, %v1477_v46  ;;  %v1188_v60 = vsel %vm893_vm7, %v1477_v46, 0.0 }
 0x1ed   : > { %1171 = vst.msk [vmem:[%s1991_s23 + $0x10] sm:$0xf] %vm1166_vm1, %v1162_v41  ;;  %v1211_v53 = vsel %vm893_vm7, %v1200_v51, 0.0  ;;  %v1163_v12 = vpack.c.bf16 %v1146_v62, %v1146_v62  ;;  %v1184_v5 = vsel %vm893_vm7, %v1146_v62, 0.0  ;;  %v1201_v63 = vmul.f32 %v1146_v62, %v1146_v62 }
 0x1ee   : > { %v1212_v57 = vadd.f32 %v1211_v53, %v1210_v47  ;;  %1174 = vst.msk [vmem:[%s1991_s23 + $0x1c] sm:$0xf] %vm1166_vm1, %v1165_v28  ;;  %v1185_v55 = vadd.f32 %v1184_v5, %v1183_v52  ;;  %v1215_v0 = vsel %vm893_vm7, %v1202_v54, 0.0  ;;  %v1217_v1 = vsel %vm893_vm7, %v1203_v26, 0.0 }
 0x1ef   : > { %1172 = vst.msk [vmem:[%s1991_s23 + $0x14] sm:$0xf] %vm1166_vm1, %v1163_v12  ;;  %v1213_v59 = vsel %vm893_vm7, %v1201_v63, 0.0 }
 0x1f0   : > { %v1187_v33 = vadd.f32 %v1186_v56, %v1185_v55  ;;  %v1214_v61 = vadd.f32 %v1213_v59, %v1212_v57 }
 0x1f2   : > { %v1189_v2 = vadd.f32 %v1188_v60, %v1187_v33  ;;  %v1216_v3 = vadd.f32 %v1215_v0, %v1214_v61 }
 0x1f4   : > { %v1190_v4 = vrot.slane %v1189_v2, 4  ;;  %v1218_v7 = vadd.f32 %v1217_v1, %v1216_v3 }
 0x1f6   : > { %v1191_v9 = vadd.f32 %v1190_v4, %v1189_v2  ;;  %v1219_v11 = vrot.slane %v1218_v7, 4 }
 0x1f8   : > { %v1192_v14 = vrot.slane %v1191_v9, 2  ;;  %v1220_v13 = vadd.f32 %v1219_v11, %v1218_v7 }
 0x1fa   : > { %v1193_v8 = vadd.f32 %v1192_v14, %v1191_v9  ;;  %v1221_v16 = vrot.slane %v1220_v13, 2 }
 0x1fc   : > { %v1194_v17 = vrot.slane %v1193_v8, 1  ;;  %v1222_v18 = vadd.f32 %v1221_v16, %v1220_v13 }
 0x1fe   : > { %v1223_v6 = vrot.slane %v1222_v18, 1  ;;  %v1195_v19 = vadd.f32 %v1194_v17, %v1193_v8 }
 0x200   : > { %v1224_v20 = vadd.f32 %v1223_v6, %v1222_v18 }
 0x202   : > { %v1226_v21 = vsel %vm649_vm0, %v1195_v19, %v1224_v20 }
 0x203   : > { %1228 = vst.msk [vmem:[%s454_s8] sm:$0x3] %vm1227_vm2, %v1226_v21 }
 0x204 PF: > { %s18_s26 = sadd.s32 1, %s1549_s26   ;;  %s2051_s24 = smov %s1545_s25 }
 0x205   : > { %p15_p5 = scmp.ge.s32.totalorder %s18_s26, 4   ;;  %s2052_s25 = smov %s2054_s27 }
 0x207   :  { %17 = sbr.rel (!%p15_p5) target bundleno = 2 (0x2), region = 92 }

// kernel: down_block.3
= control target key start
LH: loop header
LB: loop body
LE: loop exit
PB: predicated region body
PF: predicated region fallthrough
CT: control target
= control target key end

     0   :  { %s1655_s18 = smov 0   ;;  %s1657_s19 = smov 0   ;;  %s2183_s0 = inlined_call_operand.vmem [shape: bf16[2,16,8,8], index: 0, kind: input, shape index: {}, may-alias: {0,1,2}]   ;;  %s2184_s1 = inlined_call_operand.vmem [shape: bf16[2,16,8,8], index: 1, kind: input, shape index: {}, may-alias: {0,1,2}]   ;;  %s2185_s2 = inlined_call_operand.vmem [shape: bf16[2,16,8,8], index: 2, kind: input, shape index: {}, may-alias: {0,1,2}]   ;;  %s2186_s3 = inlined_call_operand.vmem [shape: bf16[36,8], index: 3, kind: input, shape index: {}]   ;;  %s2187_s4 = inlined_call_operand.vmem [shape: bf16[2,8,8,8], index: 4, kind: output, shape index: {0}]   ;;  %s2188_s5 = inlined_call_operand.vmem [shape: f32[2,1,2,8], index: 5, kind: output, shape index: {1}]  }
   0x1   :  { %s1659_s20 = smov 0  }
   0x2 LB: > { %s28_s21 = sadd.s32 1, %s1610_s19  ;;  %p1486_p0 = scmp.ge.s32.totalorder %s1614_s20, 1  ;;  %s1614_s20 = sphi %s1659_s20, %s16_s20   ;;  %s1610_s19 = sphi %s1657_s19, %s2194_s19   ;;  %s1606_s18 = sphi %s1655_s18, %s2193_s18  }
   0x3   : > { %p30_p1 = scmp.ge.s32.totalorder %s28_s21, 2  ;;  %p279_p2 = scmp.lt.s32.totalorder %s1614_s20, 3 }
   0x5   : > { %s2196_s21 = smov (%p30_p1, %s28_s21), 0  ;;  %p280_p3 = pnand %p1486_p0, %p279_p2 }
   0x6   : > { %p349_p4 = scmp.lt.s32.totalorder (!%p280_p3), %s1606_s18, 1  ;;  %s1616_s30 = smov (!%p280_p3), 124   ;;  %vm533_vm0 = vcmask (!%p280_p3), 27648   ;;  %vm750_vm1 = vcmask (!%p280_p3), 1040384   ;;  %vm751_vm2 = vsmask.f32 (!%p280_p3), 256 }
   0x7   : > { %283 = sbr.rel (%p280_p3) target bundleno = 640 (0x280), region = 36  ;;  %vm763_vm3 = vcmask (!%p280_p3), 1044480   ;;  %vm764_vm4 = vsmask.f32 (!%p280_p3), 4352  ;;  %vm1784_vm5 = vmand (!%p280_p3), %vm750_vm1, %vm751_vm2  ;;  %s1617_s10 = smov (!%p280_p3), 12   ;;  %vm1178_vm7 = vcmask (!%p280_p3), 1041408  }
   0x8   : > { %vm1793_vm6 = vmand (!%p280_p3), %vm763_vm3, %vm764_vm4  ;;  %s1618_s11 = smov (!%p280_p3), 24   ;;  %s1619_s12 = smov (!%p280_p3), 8   ;;  %vm994_vm8 = vcmask (!%p280_p3), 31744   ;;  %vm1011_vm9 = vcmask (!%p280_p3), 64512   ;;  %vm1028_vm10 = vcmask (!%p280_p3), 97280   ;;  %vm1045_vm11 = vcmask (!%p280_p3), 130048  }
   0x9   : > { %s1620_s13 = smov (!%p280_p3), 20   ;;  %s1621_s14 = smov (!%p280_p3), 32   ;;  %vm1062_vm12 = vcmask (!%p280_p3), 162816   ;;  %vm1079_vm13 = vcmask (!%p280_p3), 195584   ;;  %vm1096_vm14 = vcmask (!%p280_p3), 228352   ;;  %vm1113_vm15 = vcmask (!%p280_p3), 261120  }
   0xa   : > { %s1622_s15 = smov (!%p280_p3), 4   ;;  %s1623_s16 = smov (!%p280_p3), 16   ;;  %vm1255_vm2 = vcmask (!%p280_p3), 60416   ;;  %vm1316_vm3 = vcmask (!%p280_p3), 58368  }
   0xb   : > { %s1624_s17 = smov (!%p280_p3), 28  }
   0xe   : > { %s2198_s18 = smov (!%p349_p4, %s1606_s18), 1 }
   0xf   : > { %s1676_s22 = sshll.u32 %s2198_s18, 6  ;;  %s1524_s28 = sshll.u32 %s2198_s18, 5 }
  0x10   : > { %s1682_s25 = scalar_lea.vmem %s2183_s0, %s1676_s22  ;;  %s1521_s26 = sadd.s32 8, %s1676_s22 }
  0x11   : > { %v1686_v0 = vld [vmem:[%s1682_s25 + $0x8] sm:$0xf]  ;;  %v415_v1 = vld [vmem:[%s1682_s25] sm:$0xf]  ;;  %s370_s29 = scalar_lea.vmem %s2184_s1, %s1521_s26  ;;  %v416_v3 = vld [vmem:[%s1682_s25 + $0x4] sm:$0xf] }
  0x12   : > { %461 = vrot.lane.b32.xlu0 %v1686_v0, %s1616_s30  ;;  %457 = vrot.lane.b32.xlu1 %v415_v1, %s1616_s30  ;;  %v413_v2 = vld [vmem:[%s370_s29] sm:$0xf]  ;;  %v414_v4 = vld [vmem:[%s370_s29 + $0x4] sm:$0xf]  ;;  %s1523_s6 = sadd.s32 48, %s1676_s22  ;;  %s1495_s7 = sshll.u32 %s2198_s18, 1 }
  0x13   : > { %v418_v5 = vld [vmem:[%s1682_s25 + $0xc] sm:$0xf]  ;;  %v1702_v6 = vld [vmem:[%s1682_s25 + $0x10] sm:$0xf]  ;;  %v1705_v7 = vld [vmem:[%s1682_s25 + $0x14] sm:$0xf]  ;;  %s388_s9 = scalar_lea.vmem %s2185_s2, %s1523_s6  ;;  %s2135_s6 = scalar_lea.vmem %s2187_s4, %s1524_s28 }
  0x14   : > { %v1712_v8 = vld [vmem:[%s1682_s25 + $0x18] sm:$0xf]  ;;  %v1715_v9 = vld [vmem:[%s1682_s25 + $0x1c] sm:$0xf]  ;;  %v1722_v10 = vld [vmem:[%s1682_s25 + $0x20] sm:$0xf] }
  0x15   : > { %v1725_v11 = vld [vmem:[%s1682_s25 + $0x24] sm:$0xf]  ;;  %v1732_v12 = vld [vmem:[%s1682_s25 + $0x28] sm:$0xf]  ;;  %v1735_v13 = vld [vmem:[%s1682_s25 + $0x2c] sm:$0xf] }
  0x16   : > { %453 = vrot.lane.b32.xlu0 %v413_v2, %s1616_s30  ;;  %459 = vrot.lane.b32.xlu1 %v416_v3, %s1616_s30  ;;  %v1742_v14 = vld [vmem:[%s1682_s25 + $0x30] sm:$0xf]  ;;  %v1745_v15 = vld [vmem:[%s1682_s25 + $0x34] sm:$0xf] }
  0x17   : > { %v1753_v16 = vld [vmem:[%s1682_s25 + $0x38] sm:$0xf]  ;;  %v1756_v17 = vld [vmem:[%s1682_s25 + $0x3c] sm:$0xf]  ;;  %v1765_v18 = vld [vmem:[%s388_s9] sm:$0xf] }
  0x18   : > { %v1767_v19 = vld [vmem:[%s388_s9 + $0x4] sm:$0xf] }
  0x1a   : > { %455 = vrot.lane.b32.xlu0 %v414_v4, %s1616_s30  ;;  %463 = vrot.lane.b32.xlu1 %v418_v5, %s1616_s30 }
  0x1e   : > { %465 = vrot.lane.b32.xlu0 %v1702_v6, %s1616_s30  ;;  %467 = vrot.lane.b32.xlu1 %v1705_v7, %s1616_s30 }
  0x22   : > { %469 = vrot.lane.b32.xlu0 %v1712_v8, %s1616_s30  ;;  %471 = vrot.lane.b32.xlu1 %v1715_v9, %s1616_s30 }
  0x26   : > { %473 = vrot.lane.b32.xlu0 %v1722_v10, %s1616_s30  ;;  %475 = vrot.lane.b32.xlu1 %v1725_v11, %s1616_s30 }
  0x2a   : > { %477 = vrot.lane.b32.xlu0 %v1732_v12, %s1616_s30  ;;  %479 = vrot.lane.b32.xlu1 %v1735_v13, %s1616_s30 }
  0x2e   : > { %481 = vrot.lane.b32.xlu0 %v1742_v14, %s1616_s30  ;;  %483 = vrot.lane.b32.xlu1 %v1745_v15, %s1616_s30 }
  0x32   : > { %485 = vrot.lane.b32.xlu0 %v1753_v16, %s1616_s30  ;;  %487 = vrot.lane.b32.xlu1 %v1756_v17, %s1616_s30 }
  0x36   : > { %489 = vrot.lane.b32.xlu0 %v1765_v18, %s1616_s30  ;;  %491 = vrot.lane.b32.xlu1 %v1767_v19, %s1616_s30 }
  0x84   : > { %v462_v20 = vpop.permute.xlu0 %461  ;;  %v458_v21 = vpop.permute.xlu1 %457 }
  0x85   : > { %v515_v22 = vmax.bf16 %v458_v21, %v415_v1  ;;  %v517_v27 = vmax.bf16 %v462_v20, %v1686_v0 }
  0x87   : > { %v543_v28 = vsel %vm533_vm0, %v515_v22, 4286644096  ;;  %v550_v37 = vsel %vm533_vm0, %v517_v27, 4286644096 }
  0x88   : > { %v454_v23 = vpop.permute.xlu0 %453  ;;  %v460_v24 = vpop.permute.xlu1 %459 }
  0x89   : > { %v513_v25 = vmax.bf16 %v454_v23, %v413_v2  ;;  %v516_v26 = vmax.bf16 %v460_v24, %v416_v3 }
  0x8b   : > { %v536_v29 = vsel %vm533_vm0, %v513_v25, 4286644096  ;;  %v546_v30 = vsel %vm533_vm0, %v516_v26, 4286644096 }
  0x8c   : > { %v548_v31 = vmax.bf16 %v546_v30, %v543_v28  ;;  %v456_v32 = vpop.permute.xlu0 %455  ;;  %v464_v33 = vpop.permute.xlu1 %463 }
  0x8d   : > { %v514_v34 = vmax.bf16 %v456_v32, %v414_v4  ;;  %v518_v35 = vmax.bf16 %v464_v33, %v418_v5 }
  0x8e   : > { %v1497_v36 = vcombine.low %v548_v31, %v548_v31 }
  0x8f   : > { %v539_v38 = vsel %vm533_vm0, %v514_v34, 4286644096  ;;  %v553_v39 = vsel %vm533_vm0, %v518_v35, 4286644096 }
  0x90   : > { %v644_v40 = vshrl.u32 %v1497_v36, 16  ;;  %v685_v41 = vshll.u32 %v1497_v36, 16  ;;  %v541_v42 = vmax.bf16 %v539_v38, %v536_v29  ;;  %v555_v43 = vmax.bf16 %v553_v39, %v550_v37  ;;  %v466_v44 = vpop.permute.xlu0 %465  ;;  %v468_v45 = vpop.permute.xlu1 %467 }
  0x91   : > { %v519_v46 = vmax.bf16 %v466_v44, %v1702_v6  ;;  %v520_v47 = vmax.bf16 %v468_v45, %v1705_v7 }
  0x92   : > { %v684_v48 = vrot.slane %v644_v40, 7  ;;  %v1496_v49 = vcombine.low %v541_v42, %v541_v42  ;;  %v1498_v50 = vcombine.low %v555_v43, %v555_v43  ;;  %v731_v55 = vrot.slane %v685_v41, 7 }
  0x93   : > { %v557_v52 = vsel %vm533_vm0, %v519_v46, 4286644096  ;;  %v560_v53 = vsel %vm533_vm0, %v520_v47, 4286644096 }
  0x94   : > { %v687_v54 = vor.u32 %v685_v41, %v684_v48  ;;  %v641_v56 = vshrl.u32 %v1496_v49, 16  ;;  %v647_v57 = vshrl.u32 %v1498_v50, 16  ;;  %v470_v58 = vpop.permute.xlu0 %469  ;;  %v472_v59 = vpop.permute.xlu1 %471  ;;  %v681_v60 = vshll.u32 %v1496_v49, 16 }
  0x95   : > { %v562_v61 = vmax.bf16 %v560_v53, %v557_v52  ;;  %v521_v62 = vmax.bf16 %v470_v58, %v1712_v8  ;;  %v522_v63 = vmax.bf16 %v472_v59, %v1715_v9  ;;  %v689_v3 = vshll.u32 %v1498_v50, 16 }
  0x96   : > { %v680_v1 = vrot.slane %v641_v56, 7  ;;  %v688_v2 = vrot.slane %v647_v57, 7  ;;  %v754_v4 = vsel %vm1784_vm5, %v644_v40, %v687_v54  ;;  %v730_v34 = vrot.slane %v681_v60, 7 }
  0x97   : > { %v1499_v5 = vcombine.low %v562_v61, %v562_v61  ;;  %v564_v6 = vsel %vm533_vm0, %v521_v62, 4286644096  ;;  %v567_v7 = vsel %vm533_vm0, %v522_v63, 4286644096  ;;  %v1803_v22 = vsel %vm1793_vm6, %v754_v4, %v731_v55 }
  0x98   : > { %v683_v20 = vor.u32 %v681_v60, %v680_v1  ;;  %v691_v8 = vor.u32 %v689_v3, %v688_v2  ;;  %v569_v21 = vmax.bf16 %v567_v7, %v564_v6  ;;  %v474_v9 = vpop.permute.xlu0 %473  ;;  %v476_v23 = vpop.permute.xlu1 %475  ;;  %881 = vrot.lane.b32.xlu0 %v1803_v22, %s1617_s10  ;;  %v732_v27 = vrot.slane %v689_v3, 7 }
  0x99   : > { %v650_v24 = vshrl.u32 %v1499_v5, 16  ;;  %v523_v25 = vmax.bf16 %v474_v9, %v1722_v10  ;;  %v524_v26 = vmax.bf16 %v476_v23, %v1725_v11  ;;  %v693_v32 = vshll.u32 %v1499_v5, 16 }
  0x9a   : > { %v755_v28 = vsel %vm1784_vm5, %v647_v57, %v691_v8  ;;  %v1500_v29 = vcombine.low %v569_v21, %v569_v21  ;;  %v753_v30 = vsel %vm1784_vm5, %v641_v56, %v683_v20 }
  0x9b   : > { %v692_v31 = vrot.slane %v650_v24, 7  ;;  %v571_v33 = vsel %vm533_vm0, %v523_v25, 4286644096  ;;  %v574_v10 = vsel %vm533_vm0, %v524_v26, 4286644096  ;;  %v1817_v11 = vsel %vm1793_vm6, %v755_v28, %v732_v27 }
  0x9c   : > { %v653_v35 = vshrl.u32 %v1500_v29, 16  ;;  %v576_v36 = vmax.bf16 %v574_v10, %v571_v33  ;;  %v478_v37 = vpop.permute.xlu0 %477  ;;  %v480_v38 = vpop.permute.xlu1 %479  ;;  %v697_v40 = vshll.u32 %v1500_v29, 16  ;;  %883 = vrot.lane.b32.xlu1 %v1817_v11, %s1617_s10  ;;  %v1825_v45 = vsel %vm1793_vm6, %v753_v30, %v730_v34 }
  0x9d   : > { %v695_v39 = vor.u32 %v693_v32, %v692_v31  ;;  %v525_v41 = vmax.bf16 %v478_v37, %v1732_v12  ;;  %v526_v42 = vmax.bf16 %v480_v38, %v1735_v13  ;;  %v733_v46 = vrot.slane %v693_v32, 7 }
  0x9e   : > { %v696_v43 = vrot.slane %v653_v35, 7  ;;  %v1501_v44 = vcombine.low %v576_v36, %v576_v36  ;;  %v734_v13 = vrot.slane %v697_v40, 7 }
  0x9f   : > { %v756_v47 = vsel %vm1784_vm5, %v650_v24, %v695_v39  ;;  %v578_v48 = vsel %vm533_vm0, %v525_v41, 4286644096  ;;  %v581_v49 = vsel %vm533_vm0, %v526_v42, 4286644096 }
  0xa0   : > { %v699_v12 = vor.u32 %v697_v40, %v696_v43  ;;  %v656_v50 = vshrl.u32 %v1501_v44, 16  ;;  %v583_v52 = vmax.bf16 %v581_v49, %v578_v48  ;;  %v482_v53 = vpop.permute.xlu0 %481  ;;  %v484_v54 = vpop.permute.xlu1 %483  ;;  %v1834_v56 = vsel %vm1793_vm6, %v756_v47, %v733_v46 }
  0xa1   : > { %v527_v55 = vmax.bf16 %v482_v53, %v1742_v14  ;;  %v528_v57 = vmax.bf16 %v484_v54, %v1745_v15  ;;  %v701_v60 = vshll.u32 %v1501_v44, 16  ;;  %885 = vrot.lane.b32.xlu0 %v1834_v56, %s1617_s10  ;;  %v858_v53 = vrot.slane %v1817_v11, 1 }
  0xa2   : > { %v757_v58 = vsel %vm1784_vm5, %v653_v35, %v699_v12  ;;  %v700_v59 = vrot.slane %v656_v50, 7  ;;  %v1502_v61 = vcombine.low %v583_v52, %v583_v52 }
  0xa3   : > { %v585_v62 = vsel %vm533_vm0, %v527_v55, 4286644096  ;;  %v588_v63 = vsel %vm533_vm0, %v528_v57, 4286644096  ;;  %v1845_v14 = vsel %vm1793_vm6, %v757_v58, %v734_v13  ;;  %v859_v13 = vrot.slane %v1834_v56, 1 }
  0xa4   : > { %v703_v1 = vor.u32 %v701_v60, %v700_v59  ;;  %v659_v2 = vshrl.u32 %v1502_v61, 16  ;;  %v590_v15 = vmax.bf16 %v588_v63, %v585_v62  ;;  %v486_v3 = vpop.permute.xlu0 %485  ;;  %887 = vrot.lane.b32.xlu1 %v1845_v14, %s1617_s10  ;;  %v488_v4 = vpop.permute.xlu1 %487  ;;  %v705_v20 = vshll.u32 %v1502_v61, 16 }
  0xa5   : > { %v529_v5 = vmax.bf16 %v486_v3, %v1753_v16  ;;  %v530_v6 = vmax.bf16 %v488_v4, %v1756_v17  ;;  %938 = vrot.lane.b32.xlu0 %v1817_v11, %s1618_s11  ;;  %v735_v16 = vrot.slane %v701_v60, 7  ;;  %v860_v60 = vrot.slane %v1845_v14, 1 }
  0xa6   : > { %v704_v7 = vrot.slane %v659_v2, 7  ;;  %v1503_v8 = vcombine.low %v590_v15, %v590_v15  ;;  %v758_v23 = vsel %vm1784_vm5, %v656_v50, %v703_v1  ;;  %v736_v33 = vrot.slane %v705_v20, 7 }
  0xa7   : > { %v592_v21 = vsel %vm533_vm0, %v529_v5, 4286644096  ;;  %v595_v9 = vsel %vm533_vm0, %v530_v6, 4286644096  ;;  %v1863_v29 = vsel %vm1793_vm6, %v758_v23, %v735_v16  ;;  %v786_v62 = vshll.u32 %v1803_v22, 16 }
  0xa8   : > { %v707_v24 = vor.u32 %v705_v20, %v704_v7  ;;  %v662_v25 = vshrl.u32 %v1503_v8, 16  ;;  %v597_v26 = vmax.bf16 %v595_v9, %v592_v21  ;;  %940 = vrot.lane.b32.xlu1 %v1834_v56, %s1618_s11  ;;  %v709_v17 = vshll.u32 %v1503_v8, 16  ;;  %v490_v35 = vpop.permute.xlu0 %489  ;;  %v492_v36 = vpop.permute.xlu1 %491 }
  0xa9   : > { %942 = vrot.lane.b32.xlu0 %v1845_v14, %s1618_s11  ;;  %v531_v42 = vmax.bf16 %v490_v35, %v1765_v18  ;;  %v532_v43 = vmax.bf16 %v492_v36, %v1767_v19  ;;  %v857_v19 = vrot.slane %v1803_v22, 1  ;;  %v861_v51 = vrot.slane %v1863_v29, 1 }
  0xaa   : > { %v708_v27 = vrot.slane %v662_v25, 7  ;;  %v1504_v28 = vcombine.low %v597_v26, %v597_v26  ;;  %v759_v30 = vsel %vm1784_vm5, %v659_v2, %v707_v24  ;;  %v737_v10 = vrot.slane %v709_v17, 7 }
  0xab   : > { %v1875_v39 = vsel %vm1793_vm6, %v759_v30, %v736_v33  ;;  %v599_v47 = vsel %vm533_vm0, %v531_v42, 4286644096  ;;  %v602_v48 = vsel %vm533_vm0, %v532_v43, 4286644096  ;;  %v793_v63 = vshll.u32 %v1817_v11, 16  ;;  %v1589_v33 = vld [vmem:[%s2186_s3] sm:$0xff]  }
  0xac   : > { %v711_v31 = vor.u32 %v709_v17, %v708_v27  ;;  %v665_v32 = vshrl.u32 %v1504_v28, 16  ;;  %944 = vrot.lane.b32.xlu1 %v1863_v29, %s1618_s11  ;;  %v713_v34 = vshll.u32 %v1504_v28, 16  ;;  %v604_v12 = vmax.bf16 %v602_v48, %v599_v47  ;;  %1534 = vmatprep.subr.bf16.mxu0 %v1589_v33  ;;  %v1590_v42 = vld [vmem:[%s2186_s3 + $0x8] sm:$0xff]   ;;  %v1591_v43 = vld [vmem:[%s2186_s3 + $0x10] ss:$0 sps:$4 sm:$0x33]  }
  0xad   : > { %889 = vrot.lane.b32.xlu0 %v1863_v29, %s1617_s10  ;;  %v1919_v0 = vrot.slane %v1875_v39, 1  ;;  %v788_v2 = vrot.slane %v786_v62, 1  ;;  %v800_v15 = vshll.u32 %v1834_v56, 16  ;;  %v856_v3 = vrot.slane %v1825_v45, 1  ;;  %1548 = vmatprep.subr.bf16.mxu1 %v1589_v33 }
  0xae   : > { %v760_v37 = vsel %vm1784_vm5, %v662_v25, %v711_v31  ;;  %v712_v38 = vrot.slane %v665_v32, 7  ;;  %v738_v44 = vrot.slane %v713_v34, 7  ;;  %v1505_v18 = vcombine.low %v604_v12, %v604_v12  ;;  %1535 = vmatpush3.bf16.msra.mxu0 %v1589_v33  ;;  %1551 = vmatpush3.bf16.msra.mxu1 %v1589_v33 }
  0xaf   : > { %v1879_v40 = vsel %vm1793_vm6, %v760_v37, %v737_v10  ;;  %v795_v4 = vrot.slane %v793_v63, 1  ;;  %v784_v5 = vshrl.u32 %v1803_v22, 16  ;;  %v791_v6 = vshrl.u32 %v1817_v11, 16  ;;  %1536 = vmatprep.subr.bf16.mxu0 %v1590_v42  ;;  %1549 = vmatprep.subr.bf16.mxu1 %v1590_v42 }
  0xb0   : > { %v715_v41 = vor.u32 %v713_v34, %v712_v38  ;;  %891 = vrot.lane.b32.xlu1 %v1875_v39, %s1617_s10  ;;  %v668_v50 = vshrl.u32 %v1505_v18, 16  ;;  %v717_v52 = vshll.u32 %v1505_v18, 16  ;;  %v1925_v61 = vrot.slane %v1879_v40, 1 }
  0xb1   : > { %893 = vrot.lane.b32.xlu0 %v1879_v40, %s1617_s10  ;;  %v789_v7 = vor.u32 %v788_v2, %v784_v5  ;;  %v802_v20 = vrot.slane %v800_v15, 1  ;;  %v796_v8 = vor.u32 %v795_v4, %v791_v6  ;;  %v798_v21 = vshrl.u32 %v1834_v56, 16 }
  0xb2   : > { %v761_v46 = vsel %vm1784_vm5, %v665_v32, %v715_v41  ;;  %v716_v54 = vrot.slane %v668_v50, 7  ;;  %v739_v55 = vrot.slane %v717_v52, 7  ;;  %v807_v23 = vshll.u32 %v1845_v14, 16  ;;  %1537 = vmatpush3.bf16.msra.mxu0 %v1590_v42  ;;  %1552 = vmatpush3.bf16.msra.mxu1 %v1590_v42 }
  0xb3   : > { %v1893_v49 = vsel %vm1793_vm6, %v761_v46, %v738_v44  ;;  %v803_v9 = vor.u32 %v802_v20, %v798_v21  ;;  %v805_v25 = vshrl.u32 %v1845_v14, 16  ;;  %v814_v16 = vshll.u32 %v1863_v29, 16  ;;  %1554 = vmatprep.subr.msk.bf16.mxu0 %vm1178_vm7, %v1591_v43  ;;  %1555 = vmatprep.subr.msk.bf16.mxu1 %vm1178_vm7, %v1591_v43 }
  0xb4   : > { %895 = vrot.lane.b32.xlu1 %v1893_v49, %s1617_s10  ;;  %v719_v57 = vor.u32 %v717_v52, %v716_v54  ;;  %v920_v1 = vrot.slane %v1893_v49, 1  ;;  %v809_v24 = vrot.slane %v807_v23, 1  ;;  %v812_v27 = vshrl.u32 %v1863_v29, 16  ;;  %s410_s10 = scalar_lea.vmem %s2188_s5, %s1495_s7 }
  0xb5   : > { %946 = vrot.lane.b32.xlu0 %v1875_v39, %s1618_s11  ;;  %v816_v17 = vrot.slane %v814_v16, 1  ;;  %v821_v28 = vshll.u32 %v1875_v39, 16  ;;  %v828_v31 = vshll.u32 %v1879_v40, 16  ;;  %v819_v10 = vshrl.u32 %v1875_v39, 16 }
  0xb6   : > { %v762_v58 = vsel %vm1784_vm5, %v668_v50, %v719_v57  ;;  %v810_v26 = vor.u32 %v809_v24, %v805_v25  ;;  %v826_v36 = vshrl.u32 %v1879_v40, 16  ;;  %v900_v38 = vshll.u32 %v1893_v49, 16 }
  0xb7   : > { %v1909_v59 = vsel %vm1793_vm6, %v762_v58, %v739_v55  ;;  %v817_v30 = vor.u32 %v816_v17, %v812_v27  ;;  %v823_v32 = vrot.slane %v821_v28, 1  ;;  %v830_v34 = vrot.slane %v828_v31, 1 }
  0xb8   : > { %866 = vrot.lane.b32.xlu1 %v857_v19, %s1619_s12  ;;  %v779_v41 = vshll.u32 %v1825_v45, 16  ;;  %v902_v44 = vrot.slane %v900_v38, 1  ;;  %v898_v47 = vshrl.u32 %v1893_v49, 16  ;;  %v1180_v48 = vsel %vm1178_vm7, %v1591_v43, 0 }
  0xb9   : > { %868 = vrot.lane.b32.xlu0 %v858_v53, %s1619_s12  ;;  %v824_v35 = vor.u32 %v823_v32, %v819_v10  ;;  %v831_v37 = vor.u32 %v830_v34, %v826_v36  ;;  %v777_v12 = vshrl.u32 %v1825_v45, 16  ;;  %1539 = vmatpush3.bf16.msra.mxu0 %v1180_v48  ;;  %v957_v50 = vshll.u32 %v1909_v59, 16 }
  0xba   : > { %v781_v46 = vrot.slane %v779_v41, 1  ;;  %v903_v18 = vor.u32 %v902_v44, %v898_v47  ;;  %1553 = vmatpush3.bf16.msra.mxu1 %v1180_v48  ;;  %v955_v52 = vshrl.u32 %v1909_v59, 16  ;;  %v977_v62 = vrot.slane %v1909_v59, 1 }
  0xbb   : > { %vm1165_vm0 = vcmask 293888  }
  0xbc   : > { %870 = vrot.lane.b32.xlu1 %v859_v13, %s1619_s12 }
  0xbd   : > { %921 = vrot.lane.b32.xlu0 %v857_v19, %s1620_s13  ;;  %v782_v19 = vor.u32 %v781_v46, %v777_v12 }
  0xc0   : > { %923 = vrot.lane.b32.xlu1 %v858_v53, %s1620_s13 }
  0xc1   : > { %925 = vrot.lane.b32.xlu0 %v859_v13, %s1620_s13 }
  0xc4   : > { %927 = vrot.lane.b32.xlu1 %v860_v60, %s1620_s13 }
  0xc5   : > { %978 = vrot.lane.b32.xlu0 %v858_v53, %s1621_s14  ;;  %v959_v53 = vrot.slane %v957_v50, 1 }
  0xc7   : > { %v960_v55 = vor.u32 %v959_v53, %v955_v52 }
  0xc8   : > { %980 = vrot.lane.b32.xlu1 %v859_v13, %s1621_s14 }
  0xc9   : > { %982 = vrot.lane.b32.xlu0 %v860_v60, %s1621_s14 }
  0xcc   : > { %984 = vrot.lane.b32.xlu1 %v861_v51, %s1621_s14 }
  0xcd   : > { %872 = vrot.lane.b32.xlu0 %v860_v60, %s1619_s12 }
  0xd0   : > { %874 = vrot.lane.b32.xlu1 %v861_v51, %s1619_s12 }
  0xd1   : > { %876 = vrot.lane.b32.xlu0 %v1919_v0, %s1619_s12 }
  0xd4   : > { %878 = vrot.lane.b32.xlu1 %v1925_v61, %s1619_s12 }
  0xd5   : > { %929 = vrot.lane.b32.xlu0 %v861_v51, %s1620_s13 }
  0xd8   : > { %931 = vrot.lane.b32.xlu1 %v1919_v0, %s1620_s13 }
  0xd9   : > { %933 = vrot.lane.b32.xlu0 %v1925_v61, %s1620_s13 }
  0xdc   : > { %935 = vrot.lane.b32.xlu1 %v920_v1, %s1620_s13 }
  0xdd   : > { %864 = vrot.lane.b32.xlu0 %v856_v3, %s1619_s12 }
  0xe0   : > { %834 = vrot.lane.b32.xlu1 %v789_v7, %s1622_s15 }
  0xe1   : > { %836 = vrot.lane.b32.xlu0 %v796_v8, %s1622_s15 }
  0xe4   : > { %838 = vrot.lane.b32.xlu1 %v803_v9, %s1622_s15 }
  0xe5   : > { %904 = vrot.lane.b32.xlu0 %v789_v7, %s1623_s16 }
  0xe8   : > { %906 = vrot.lane.b32.xlu1 %v796_v8, %s1623_s16 }
  0xe9   : > { %908 = vrot.lane.b32.xlu0 %v803_v9, %s1623_s16 }
  0xec   : > { %910 = vrot.lane.b32.xlu1 %v810_v26, %s1623_s16 }
  0xed   : > { %961 = vrot.lane.b32.xlu0 %v796_v8, %s1624_s17 }
  0xf0   : > { %963 = vrot.lane.b32.xlu1 %v803_v9, %s1624_s17 }
  0xf1   : > { %965 = vrot.lane.b32.xlu0 %v810_v26, %s1624_s17 }
  0xf4   : > { %967 = vrot.lane.b32.xlu1 %v817_v30, %s1624_s17 }
  0xf5   : > { %840 = vrot.lane.b32.xlu0 %v810_v26, %s1622_s15 }
  0xf8   : > { %842 = vrot.lane.b32.xlu1 %v817_v30, %s1622_s15 }
  0xf9   : > { %844 = vrot.lane.b32.xlu0 %v824_v35, %s1622_s15 }
  0xfc   : > { %846 = vrot.lane.b32.xlu1 %v831_v37, %s1622_s15 }
  0xfd   : > { %912 = vrot.lane.b32.xlu0 %v817_v30, %s1623_s16 }
 0x100   : > { %914 = vrot.lane.b32.xlu1 %v824_v35, %s1623_s16 }
 0x101   : > { %916 = vrot.lane.b32.xlu0 %v831_v37, %s1623_s16 }
 0x104   : > { %918 = vrot.lane.b32.xlu1 %v903_v18, %s1623_s16 }
 0x105   : > { %832 = vrot.lane.b32.xlu0 %v782_v19, %s1622_s15 }
 0x108   : > { %948 = vrot.lane.b32.xlu1 %v1879_v40, %s1618_s11 }
 0x109   : > { %950 = vrot.lane.b32.xlu0 %v1893_v49, %s1618_s11 }
 0x10a   : > { %v1992_v54 = vpop.permute.xlu0 %881 }
 0x10c   : > { %952 = vrot.lane.b32.xlu1 %v1909_v59, %s1618_s11 }
 0x10d   : > { %969 = vrot.lane.b32.xlu0 %v824_v35, %s1624_s17 }
 0x10e   : > { %v884_v13 = vpop.permute.xlu1 %883 }
 0x110   : > { %971 = vrot.lane.b32.xlu1 %v831_v37, %s1624_s17 }
 0x111   : > { %973 = vrot.lane.b32.xlu0 %v903_v18, %s1624_s17 }
 0x113   : > { %v886_v57 = vpop.permute.xlu0 %885 }
 0x114   : > { %975 = vrot.lane.b32.xlu1 %v960_v55, %s1624_s17 }
 0x115   : > { %986 = vrot.lane.b32.xlu0 %v1919_v0, %s1621_s14 }
 0x116   : > { %v888_v58 = vpop.permute.xlu1 %887 }
 0x117   : > { %v1999_v60 = vpop.permute.xlu0 %938 }
 0x118   : > { %988 = vrot.lane.b32.xlu1 %v1925_v61, %s1621_s14 }
 0x119   : > { %990 = vrot.lane.b32.xlu0 %v920_v1, %s1621_s14 }
 0x11a   : > { %v941_v51 = vpop.permute.xlu1 %940 }
 0x11b   : > { %v943_v63 = vpop.permute.xlu0 %942 }
 0x11c   : > { %992 = vrot.lane.b32.xlu1 %v977_v62, %s1621_s14 }
 0x11e   : > { %v945_v2 = vpop.permute.xlu1 %944 }
 0x11f   : > { %v2008_v15 = vpop.permute.xlu0 %889 }
 0x122   : > { %v2010_v0 = vpop.permute.xlu1 %891 }
 0x123   : > { %v2012_v3 = vpop.permute.xlu0 %893 }
 0x126   : > { %v2014_v4 = vpop.permute.xlu1 %895 }
 0x127   : > { %v2016_v61 = vpop.permute.xlu0 %946 }
 0x12a   : > { %v867_v5 = vpop.permute.xlu1 %866 }
 0x12b   : > { %v869_v49 = vpop.permute.xlu0 %868 }
 0x12e   : > { %v871_v1 = vpop.permute.xlu1 %870 }
 0x12f   : > { %v2018_v6 = vpop.permute.xlu0 %921 }
 0x132   : > { %v924_v59 = vpop.permute.xlu1 %923 }
 0x133   : > { %v926_v7 = vpop.permute.xlu0 %925 }
 0x136   : > { %v928_v20 = vpop.permute.xlu1 %927 }
 0x137   : > { %v2020_v8 = vpop.permute.xlu0 %978 }
 0x13a   : > { %v981_v21 = vpop.permute.xlu1 %980 }
 0x13b   : > { %v983_v9 = vpop.permute.xlu0 %982 }
 0x13e   : > { %v985_v23 = vpop.permute.xlu1 %984 }
 0x13f   : > { %v2022_v24 = vpop.permute.xlu0 %872 }
 0x142   : > { %v2024_v25 = vpop.permute.xlu1 %874 }
 0x143   : > { %v2026_v26 = vpop.permute.xlu0 %876 }
 0x146   : > { %v2028_v16 = vpop.permute.xlu1 %878 }
 0x147   : > { %v2030_v17 = vpop.permute.xlu0 %929 }
 0x14a   : > { %v2032_v27 = vpop.permute.xlu1 %931 }
 0x14b   : > { %v2034_v28 = vpop.permute.xlu0 %933 }
 0x14e   : > { %v2036_v30 = vpop.permute.xlu1 %935 }
 0x14f   : > { %v865_v31 = vpop.permute.xlu0 %864 }
 0x152   : > { %v835_v32 = vpop.permute.xlu1 %834 }
 0x153   : > { %v998_v33 = vsel %vm994_vm8, %v1803_v22, %v835_v32  ;;  %v837_v10 = vpop.permute.xlu0 %836 }
 0x154   : > { %v1015_v34 = vsel %vm1011_vm9, %v998_v33, %v867_v5  ;;  %v1000_v35 = vsel %vm994_vm8, %v1817_v11, %v837_v10 }
 0x155   : > { %v1032_v36 = vsel %vm1028_vm10, %v1015_v34, %v884_v13  ;;  %v1017_v37 = vsel %vm1011_vm9, %v1000_v35, %v869_v49 }
 0x156   : > { %v839_v38 = vpop.permute.xlu1 %838  ;;  %v1034_v42 = vsel %vm1028_vm10, %v1017_v37, %v886_v57 }
 0x157   : > { %v1002_v41 = vsel %vm994_vm8, %v1834_v56, %v839_v38  ;;  %v905_v43 = vpop.permute.xlu0 %904 }
 0x158   : > { %v1019_v44 = vsel %vm1011_vm9, %v1002_v41, %v871_v1 }
 0x159   : > { %v1036_v22 = vsel %vm1028_vm10, %v1019_v44, %v888_v58 }
 0x15a   : > { %v907_v46 = vpop.permute.xlu1 %906 }
 0x15b   : > { %v1049_v11 = vsel %vm1045_vm11, %v1032_v36, %v907_v46  ;;  %v909_v47 = vpop.permute.xlu0 %908 }
 0x15c   : > { %v1066_v48 = vsel %vm1062_vm12, %v1049_v11, %v924_v59  ;;  %v1051_v12 = vsel %vm1045_vm11, %v1034_v42, %v909_v47 }
 0x15d   : > { %v1083_v56 = vsel %vm1079_vm13, %v1066_v48, %v941_v51  ;;  %v1068_v18 = vsel %vm1062_vm12, %v1051_v12, %v926_v7 }
 0x15e   : > { %v911_v19 = vpop.permute.xlu1 %910  ;;  %v1085_v52 = vsel %vm1079_vm13, %v1068_v18, %v943_v63 }
 0x15f   : > { %v1053_v50 = vsel %vm1045_vm11, %v1036_v22, %v911_v19  ;;  %v962_v53 = vpop.permute.xlu0 %961 }
 0x160   : > { %v1070_v13 = vsel %vm1062_vm12, %v1053_v50, %v928_v20 }
 0x161   : > { %v1087_v55 = vsel %vm1079_vm13, %v1070_v13, %v945_v2 }
 0x162   : > { %v964_v57 = vpop.permute.xlu1 %963 }
 0x163   : > { %v1100_v58 = vsel %vm1096_vm14, %v1083_v56, %v964_v57  ;;  %v966_v62 = vpop.permute.xlu0 %965 }
 0x164   : > { %v1117_v51 = vsel %vm1113_vm15, %v1100_v58, %v981_v21  ;;  %v1102_v5 = vsel %vm1096_vm14, %v1085_v52, %v966_v62 }
 0x165   : > { %v1119_v49 = vsel %vm1113_vm15, %v1102_v5, %v983_v9 }
 0x166   : > { %v968_v1 = vpop.permute.xlu1 %967 }
 0x167   : > { %v1104_v63 = vsel %vm1096_vm14, %v1087_v55, %v968_v1  ;;  %v841_v59 = vpop.permute.xlu0 %840 }
 0x168   : > { %v1121_v7 = vsel %vm1113_vm15, %v1104_v63, %v985_v23  ;;  %v1004_v23 = vsel %vm994_vm8, %v1845_v14, %v841_v59 }
 0x169   : > { %v1507_v20 = vcombine.low %v1119_v49, %v1121_v7 }
 0x16a   : > { %v843_v32 = vpop.permute.xlu1 %842 }
 0x16b   : > { %v845_v33 = vpop.permute.xlu0 %844  ;;  %v1006_v46 = vsel %vm994_vm8, %v1863_v29, %v843_v32 }
 0x16c   : > { %v1008_v29 = vsel %vm994_vm8, %v1875_v39, %v845_v33 }
 0x16d   : > { %v1025_v39 = vsel %vm1011_vm9, %v1008_v29, %v2026_v26 }
 0x16e   : > { %v847_v2 = vpop.permute.xlu1 %846  ;;  %v1042_v19 = vsel %vm1028_vm10, %v1025_v39, %v2012_v3 }
 0x16f   : > { %v913_v10 = vpop.permute.xlu0 %912 }
 0x172   : > { %v915_v34 = vpop.permute.xlu1 %914 }
 0x173   : > { %v917_v35 = vpop.permute.xlu0 %916 }
 0x174   : > { %v1059_v26 = vsel %vm1045_vm11, %v1042_v19, %v917_v35 }
 0x175   : > { %v1076_v57 = vsel %vm1062_vm12, %v1059_v26, %v2034_v28 }
 0x176   : > { %v919_v36 = vpop.permute.xlu1 %918 }
 0x177   : > { %v833_v37 = vpop.permute.xlu0 %832 }
 0x178   : > { %v996_v21 = vsel %vm994_vm8, %v1825_v45, %v833_v37 }
 0x179   : > { %v1013_v9 = vsel %vm1011_vm9, %v996_v21, %v865_v31  ;;  %v1021_v31 = vsel %vm1011_vm9, %v1004_v23, %v2022_v24  ;;  %v1010_v24 = vsel %vm994_vm8, %v1879_v40, %v847_v2 }
 0x17a   : > { %v949_v38 = vpop.permute.xlu1 %948  ;;  %v1030_v41 = vsel %vm1028_vm10, %v1013_v9, %v1992_v54 }
 0x17b   : > { %v1047_v42 = vsel %vm1045_vm11, %v1030_v41, %v905_v43  ;;  %v951_v44 = vpop.permute.xlu0 %950 }
 0x17c   : > { %v1064_v22 = vsel %vm1062_vm12, %v1047_v42, %v2018_v6  ;;  %v1023_v6 = vsel %vm1011_vm9, %v1006_v46, %v2024_v25 }
 0x17d   : > { %v1081_v45 = vsel %vm1079_vm13, %v1064_v22, %v1999_v60  ;;  %v1038_v60 = vsel %vm1028_vm10, %v1021_v31, %v2008_v15  ;;  %v1027_v15 = vsel %vm1011_vm9, %v1010_v24, %v2028_v16 }
 0x17e   : > { %v953_v11 = vpop.permute.xlu1 %952  ;;  %v1098_v54 = vsel %vm1096_vm14, %v1081_v45, %v962_v53  ;;  %v1055_v12 = vsel %vm1045_vm11, %v1038_v60, %v913_v10 }
 0x17f   : > { %v970_v47 = vpop.permute.xlu0 %969  ;;  %v1115_v14 = vsel %vm1113_vm15, %v1098_v54, %v2020_v8  ;;  %v1040_v8 = vsel %vm1028_vm10, %v1023_v6, %v2010_v0  ;;  %v1072_v40 = vsel %vm1062_vm12, %v1055_v12, %v2030_v17  ;;  %v1044_v0 = vsel %vm1028_vm10, %v1027_v15, %v2014_v4 }
 0x180   : > { %v1506_v43 = vcombine.low %v1115_v14, %v1117_v51  ;;  %v1057_v25 = vsel %vm1045_vm11, %v1040_v8, %v915_v34  ;;  %v1061_v16 = vsel %vm1045_vm11, %v1044_v0, %v919_v36  ;;  %v1089_v17 = vsel %vm1079_vm13, %v1072_v40, %v2016_v61 }
 0x181   : > { %v1074_v50 = vsel %vm1062_vm12, %v1057_v25, %v2032_v27  ;;  %v1106_v13 = vsel %vm1096_vm14, %v1089_v17, %v970_v47  ;;  %v1078_v58 = vsel %vm1062_vm12, %v1061_v16, %v2036_v30  ;;  %v1093_v61 = vsel %vm1079_vm13, %v1076_v57, %v951_v44 }
 0x182   : > { %v972_v48 = vpop.permute.xlu1 %971  ;;  %1540 = vmatprep.mubr.msk.bf16.mxu0 %vm1165_vm0, %v1506_v43  ;;  %v1091_v53 = vsel %vm1079_vm13, %v1074_v50, %v949_v38  ;;  %v1095_v5 = vsel %vm1079_vm13, %v1078_v58, %v953_v11 }
 0x183   : > { %v974_v56 = vpop.permute.xlu0 %973  ;;  %1541 = vmatmul.mubr.msk.bf16.vlgmr.msra.gmra.mrb[0].mxu0 %vm1165_vm0, %v1507_v20  ;;  %v1108_v3 = vsel %vm1096_vm14, %v1091_v53, %v972_v48 }
 0x184   : > { %v1110_v49 = vsel %vm1096_vm14, %v1093_v61, %v974_v56 }
 0x186   : > { %v976_v18 = vpop.permute.xlu1 %975 }
 0x187   : > { %v987_v52 = vpop.permute.xlu0 %986  ;;  %v1112_v1 = vsel %vm1096_vm14, %v1095_v5, %v976_v18 }
 0x188   : > { %v1123_v4 = vsel %vm1113_vm15, %v1106_v13, %v987_v52 }
 0x18a   : > { %v989_v55 = vpop.permute.xlu1 %988 }
 0x18b   : > { %v1125_v27 = vsel %vm1113_vm15, %v1108_v3, %v989_v55  ;;  %v991_v62 = vpop.permute.xlu0 %990 }
 0x18c   : > { %v1508_v51 = vcombine.low %v1123_v4, %v1125_v27  ;;  %v1127_v59 = vsel %vm1113_vm15, %v1110_v49, %v991_v62 }
 0x18e   : > { %1544 = vmatprep.mubr.msk.bf16.mxu1 %vm1165_vm0, %v1508_v51  ;;  %v993_v63 = vpop.permute.xlu1 %992 }
 0x18f   : > { %v1129_v28 = vsel %vm1113_vm15, %v1112_v1, %v993_v63 }
 0x190   : > { %v1509_v7 = vcombine.low %v1127_v59, %v1129_v28 }
 0x192   : > { %1545 = vmatmul.mubr.msk.bf16.vlgmr.msra.gmra.mrb[0].mxu1 %vm1165_vm0, %v1509_v7 }
 0x256   : > { %v1542_v30 = vpop.f32.mrb[0].mxu0 }
 0x257   : > { %v1249_v20 = vpack.c.bf16 %v1542_v30, %v1542_v30  ;;  %v1216_v32 = vpop.f32.mrb[1].mxu0  ;;  %v1287_v34 = vmul.f32 %v1542_v30, %v1542_v30  ;;  %v1267_v23 = vsel %vm1011_vm9, %v1542_v30, 0.0 }
 0x258   : > { %v1247_v33 = vpack.c.bf16 %v1216_v32, %v1216_v32  ;;  %v1285_v2 = vmul.f32 %v1216_v32, %v1216_v32  ;;  %v1543_v10 = vpop.f32.mrb[2].mxu0  ;;  %v1264_v37 = vsel %vm1011_vm9, %v1216_v32, 0.0 }
 0x259   : > { %1258 = vst.msk [vmem:[%s2135_s6 + $0x8] sm:$0xf] %vm1255_vm2, %v1249_v20  ;;  %v1250_v35 = vpack.c.bf16 %v1543_v10, %v1543_v10  ;;  %v1219_v36 = vpop.f32.mrb[3].mxu0  ;;  %v1288_v44 = vmul.f32 %v1543_v10, %v1543_v10  ;;  %v1296_v45 = vsel %vm1011_vm9, %v1287_v34, 0.0  ;;  %v1269_v31 = vsel %vm1011_vm9, %v1543_v10, 0.0 }
 0x25a   : > { %1256 = vst.msk [vmem:[%s2135_s6] sm:$0xf] %vm1255_vm2, %v1247_v33  ;;  %v1248_v21 = vpack.c.bf16 %v1219_v36, %v1219_v36  ;;  %v1265_v9 = vsel %vm1011_vm9, %v1219_v36, 0.0  ;;  %v1286_v38 = vmul.f32 %v1219_v36, %v1219_v36  ;;  %v1293_v42 = vsel %vm1011_vm9, %v1285_v2, 0.0 }
 0x25b   : > { %1259 = vst.msk [vmem:[%s2135_s6 + $0xc] sm:$0xf] %vm1255_vm2, %v1250_v35  ;;  %v1266_v41 = vadd.f32 %v1265_v9, %v1264_v37  ;;  %v1298_v14 = vsel %vm1011_vm9, %v1288_v44, 0.0 }
 0x25c   : > { %1257 = vst.msk [vmem:[%s2135_s6 + $0x4] sm:$0xf] %vm1255_vm2, %v1248_v21  ;;  %v1294_v22 = vsel %vm1011_vm9, %v1286_v38, 0.0 }
 0x25d   : > { %v1268_v46 = vadd.f32 %v1267_v23, %v1266_v41  ;;  %v1295_v11 = vadd.f32 %v1294_v22, %v1293_v42 }
 0x25f   : > { %v1297_v54 = vadd.f32 %v1296_v45, %v1295_v11  ;;  %v1270_v47 = vadd.f32 %v1269_v31, %v1268_v46 }
 0x261   : > { %v1299_v6 = vadd.f32 %v1298_v14, %v1297_v54 }
 0x265   : > { %v1546_v43 = vpop.f32.mrb[0].mxu1 }
 0x266   : > { %v1253_v29 = vpack.c.bf16 %v1546_v43, %v1546_v43  ;;  %v1232_v60 = vpop.f32.mrb[1].mxu1  ;;  %v1291_v19 = vmul.f32 %v1546_v43, %v1546_v43  ;;  %v1275_v26 = vsel %vm1011_vm9, %v1546_v43, 0.0 }
 0x267   : > { %v1251_v24 = vpack.c.bf16 %v1232_v60, %v1232_v60  ;;  %v1271_v48 = vsel %vm1011_vm9, %v1232_v60, 0.0  ;;  %v1289_v12 = vmul.f32 %v1232_v60, %v1232_v60  ;;  %v1547_v8 = vpop.f32.mrb[2].mxu1 }
 0x268   : > { %1262 = vst.msk [vmem:[%s2135_s6 + $0x18] sm:$0xf] %vm1255_vm2, %v1253_v29  ;;  %v1272_v56 = vadd.f32 %v1271_v48, %v1270_v47  ;;  %v1254_v39 = vpack.c.bf16 %v1547_v8, %v1547_v8  ;;  %v1235_v15 = vpop.f32.mrb[3].mxu1  ;;  %v1292_v16 = vmul.f32 %v1547_v8, %v1547_v8  ;;  %v1277_v13 = vsel %vm1011_vm9, %v1547_v8, 0.0 }
 0x269   : > { %1260 = vst.msk [vmem:[%s2135_s6 + $0x10] sm:$0xf] %vm1255_vm2, %v1251_v24  ;;  %v1300_v25 = vsel %vm1011_vm9, %v1289_v12, 0.0  ;;  %v1252_v40 = vpack.c.bf16 %v1235_v15, %v1235_v15  ;;  %v1273_v18 = vsel %vm1011_vm9, %v1235_v15, 0.0  ;;  %v1290_v52 = vmul.f32 %v1235_v15, %v1235_v15 }
 0x26a   : > { %v1301_v0 = vadd.f32 %v1300_v25, %v1299_v6  ;;  %1263 = vst.msk [vmem:[%s2135_s6 + $0x1c] sm:$0xf] %vm1255_vm2, %v1254_v39  ;;  %v1274_v50 = vadd.f32 %v1273_v18, %v1272_v56  ;;  %v1304_v55 = vsel %vm1011_vm9, %v1291_v19, 0.0  ;;  %v1306_v57 = vsel %vm1011_vm9, %v1292_v16, 0.0 }
 0x26b   : > { %1261 = vst.msk [vmem:[%s2135_s6 + $0x14] sm:$0xf] %vm1255_vm2, %v1252_v40  ;;  %v1302_v17 = vsel %vm1011_vm9, %v1290_v52, 0.0 }
 0x26c   : > { %v1276_v53 = vadd.f32 %v1275_v26, %v1274_v50  ;;  %v1303_v3 = vadd.f32 %v1302_v17, %v1301_v0 }
 0x26e   : > { %v1278_v4 = vadd.f32 %v1277_v13, %v1276_v53  ;;  %v1305_v27 = vadd.f32 %v1304_v55, %v1303_v3 }
 0x270   : > { %v1279_v58 = vrot.slane %v1278_v4, 4  ;;  %v1307_v62 = vadd.f32 %v1306_v57, %v1305_v27 }
 0x272   : > { %v1280_v51 = vadd.f32 %v1279_v58, %v1278_v4  ;;  %v1308_v61 = vrot.slane %v1307_v62, 4 }
 0x274   : > { %v1281_v5 = vrot.slane %v1280_v51, 2  ;;  %v1309_v49 = vadd.f32 %v1308_v61, %v1307_v62 }
 0x276   : > { %v1282_v1 = vadd.f32 %v1281_v5, %v1280_v51  ;;  %v1310_v63 = vrot.slane %v1309_v49, 2 }
 0x278   : > { %v1283_v59 = vrot.slane %v1282_v1, 1  ;;  %v1311_v28 = vadd.f32 %v1310_v63, %v1309_v49 }
 0x27a   : > { %v1312_v7 = vrot.slane %v1311_v28, 1  ;;  %v1284_v30 = vadd.f32 %v1283_v59, %v1282_v1 }
 0x27c   : > { %v1313_v20 = vadd.f32 %v1312_v7, %v1311_v28 }
 0x27e   : > { %v1315_v32 = vsel %vm750_vm1, %v1284_v30, %v1313_v20 }
 0x27f   : > { %1317 = vst.msk [vmem:[%s410_s10] sm:$0x3] %vm1316_vm3, %v1315_v32 }
 0x280 PF: > { %s16_s20 = sadd.s32 1, %s1614_s20   ;;  %s2193_s18 = smov %s1610_s19 }
 0x281   : > { %p13_p5 = scmp.ge.s32.totalorder %s16_s20, 4   ;;  %s2194_s19 = smov %s2196_s21 }
 0x283   :  { %15 = sbr.rel (!%p13_p5) target bundleno = 2 (0x2), region = 84 }

</bundles_post_ra>
